<compile_context>
chip_gen: v7x
topology: tpu7x:2x2x1
jax: 0.10.0
libtpu: 0.0.40
codegen_flags: <defaults>
</compile_context>

<pallas_src>
import functools

import jax
import jax.numpy as jnp
from jax.experimental import pallas as pl
from jax.experimental.pallas import tpu as pltpu

SELU_ALPHA = 1.6732632423543772
SELU_SCALE = 1.0507009873554805


def _selu(x):
    # exp only matters for x <= 0; clamp its argument so the untaken branch of
    # the select never produces inf.  exp/tanh ride the EUP slot (free vs HBM).
    neg = SELU_ALPHA * (jnp.exp(jnp.minimum(x, 0.0)) - 1.0)
    return SELU_SCALE * jnp.where(x > 0.0, x, neg)


def tagger_mlp_kernel(x_ref, w1_ref, b1_ref, w2_ref, b2_ref, w3_ref, b3_ref,
                      o_ref):
    """MLP hot path: Linear -> SELU -> Linear -> Tanh -> (Dropout id) -> Linear."""
    x = x_ref[...]                                              # bf16 [tm, D]
    h = jnp.dot(x, w1_ref[...], preferred_element_type=jnp.float32)
    h = _selu(h + b1_ref[...])                                  # f32 math
    h = jnp.dot(h.astype(w2_ref.dtype), w2_ref[...],
                preferred_element_type=jnp.float32)
    h = jnp.tanh(h + b2_ref[...])                               # f32 math
    # Dropout(0.1): identity in eval mode.
    o = jnp.dot(h.astype(w3_ref.dtype), w3_ref[...],
                preferred_element_type=jnp.float32) + b3_ref[...]
    o_ref[...] = o.astype(o_ref.dtype)                          # lane-dense slab


@functools.partial(jax.jit, static_argnames=("tm",))
def gptj_tagger_forward(text, att_mask, emb_table, w1, b1, w2, b2, w3, b3,
                        tm=512):
    """text: [B, 1, S] int32 token ids; att_mask unused (matches PyTorch fwd)."""
    del att_mask  # unused in the reference forward pass
    B, _, S = text.shape
    n_dims = emb_table.shape[1]
    num_labels = w3.shape[1]

    # Lane-dense output slab: pad the label dim up to a multiple of 128 lanes.
    labels_pad = pl.cdiv(num_labels, 128) * 128
    w3p = jnp.pad(w3, ((0, 0), (0, labels_pad - num_labels)))
    b3p = jnp.pad(b3, ((0, 0), (0, labels_pad - num_labels)))

    # cdiv grid with a zero-padded token-id tail (pad 4 B ids, not 2*D B rows).
    N = B * S
    grid_m = pl.cdiv(N, tm)
    n_pad = grid_m * tm
    ids = text[:, 0, :].reshape(-1)                    # squeeze(1) -> [N]
    if n_pad != N:
        ids = jnp.pad(ids, (0, n_pad - N))
    x = jnp.take(emb_table, ids, axis=0)               # frozen gather (bf16)

    flops = 2 * n_pad * n_dims * (2 * n_dims + labels_pad)
    bytes_accessed = (
        x.size * x.dtype.itemsize
        + w1.size * w1.dtype.itemsize + w2.size * w2.dtype.itemsize
        + w3p.size * w3p.dtype.itemsize
        + (b1.size + b2.size + b3p.size) * 4
        + n_pad * labels_pad * 4)

    out = pl.pallas_call(
        tagger_mlp_kernel,
        out_shape=jax.ShapeDtypeStruct((n_pad, labels_pad), jnp.float32),
        grid_spec=pltpu.PrefetchScalarGridSpec(
            num_scalar_prefetch=0,
            grid=(grid_m,),
            in_specs=[
                pl.BlockSpec((tm, n_dims), lambda i: (i, 0)),          # x tile
                pl.BlockSpec((n_dims, n_dims), lambda i: (0, 0)),      # W1
                pl.BlockSpec((1, n_dims), lambda i: (0, 0)),           # b1
                pl.BlockSpec((n_dims, n_dims), lambda i: (0, 0)),      # W2
                pl.BlockSpec((1, n_dims), lambda i: (0, 0)),           # b2
                pl.BlockSpec((n_dims, labels_pad), lambda i: (0, 0)),  # W3 (padded)
                pl.BlockSpec((1, labels_pad), lambda i: (0, 0)),       # b3 (padded)
            ],
            out_specs=pl.BlockSpec((tm, labels_pad), lambda i: (i, 0)),
        ),
        compiler_params=pltpu.CompilerParams(
            dimension_semantics=("parallel",)),
        cost_estimate=pl.CostEstimate(
            flops=flops,
            transcendentals=2 * n_pad * n_dims,        # exp (SELU) + tanh
            bytes_accessed=bytes_accessed),
    )(x, w1, b1, w2, b2, w3p, b3p)

    return out[:N, :num_labels].reshape(B, S, num_labels)


def _init_params(key, vocab_size, n_dims, num_labels):
    """Deterministic synthetic parameters (stand-in for the checkpoint).

    Weights/embeddings stored in bf16 (HBM-bandwidth win); biases in f32.
    Linear weights are stored as [in, out] (transposed vs torch's [out, in]).
    """
    ks = jax.random.split(key, 7)
    scale = 1.0 / float(n_dims) ** 0.5
    emb = jax.random.normal(ks[0], (vocab_size, n_dims), jnp.float32).astype(jnp.bfloat16)
    w1 = (jax.random.normal(ks[1], (n_dims, n_dims), jnp.float32) * scale).astype(jnp.bfloat16)
    b1 = jax.random.normal(ks[2], (1, n_dims), jnp.float32) * 0.01
    w2 = (jax.random.normal(ks[3], (n_dims, n_dims), jnp.float32) * scale).astype(jnp.bfloat16)
    b2 = jax.random.normal(ks[4], (1, n_dims), jnp.float32) * 0.01
    w3 = (jax.random.normal(ks[5], (n_dims, num_labels), jnp.float32) * scale).astype(jnp.bfloat16)
    b3 = jax.random.normal(ks[6], (1, num_labels), jnp.float32) * 0.01
    return emb, w1, b1, w2, b2, w3, b3


def _reference(text, emb, w1, b1, w2, b2, w3, b3):
    """Pure-jnp reference mirroring the kernel's mixed-precision policy."""
    ids = text[:, 0, :]
    x = jnp.take(emb, ids, axis=0)
    h = _selu(jnp.dot(x, w1, preferred_element_type=jnp.float32) + b1)
    h = jnp.tanh(jnp.dot(h.astype(jnp.bfloat16), w2,
                         preferred_element_type=jnp.float32) + b2)
    return jnp.dot(h.astype(jnp.bfloat16), w3,
                   preferred_element_type=jnp.float32) + b3


if __name__ == "__main__":
    key = jax.random.PRNGKey(0)
    vocab_size, n_dims, num_labels = 1000, 128, 8
    B, S = 4, 250   # N = 1000 tokens -> grid of 2 tiles (tm=512) + padded tail

    k_param, k_ids = jax.random.split(key)
    emb, w1, b1, w2, b2, w3, b3 = _init_params(k_param, vocab_size, n_dims,
                                               num_labels)

    text = jax.random.randint(k_ids, (B, 1, S), 0, vocab_size, dtype=jnp.int32)
    att_mask = jnp.ones((B, S), jnp.int32)  # unused by forward, kept for parity

    out = gptj_tagger_forward(text, att_mask, emb, w1, b1, w2, b2, w3, b3)
    out = jax.block_until_ready(out)

    ref = _reference(text, emb, w1, b1, w2, b2, w3, b3)
    assert out.shape == (B, S, num_labels), out.shape
    assert jnp.allclose(out, ref, atol=1e-3, rtol=1e-3), "mismatch vs reference"

    print("KERNEL_OK")
</pallas_src>

<mosaic_0001>
module attributes {stable_mosaic.version = 11 : i64} {
  func.func @tagger_mlp_kernel(%arg0: i32, %arg1: memref<512x128xbf16, #tpu.memory_space<vmem>>, %arg2: memref<128x128xbf16, #tpu.memory_space<vmem>>, %arg3: memref<1x128xf32, #tpu.memory_space<vmem>>, %arg4: memref<128x128xbf16, #tpu.memory_space<vmem>>, %arg5: memref<1x128xf32, #tpu.memory_space<vmem>>, %arg6: memref<128x128xbf16, #tpu.memory_space<vmem>>, %arg7: memref<1x128xf32, #tpu.memory_space<vmem>>, %arg8: memref<512x128xf32, #tpu.memory_space<vmem>>) attributes {dimension_semantics = [#tpu.dimension_semantics<parallel>], iteration_bounds = array<i64: 2>, scalar_prefetch = 0 : i64, scratch_operands = 0 : i64, tpu.core_type = #tpu.core_type<tc>, window_params = [{transform_indices = @transform_0, window_bounds = array<i64: 512, 128>}, {pipeline_mode = #tpu.pipeline_mode<synchronous>, transform_indices = @transform_1, window_bounds = array<i64: 128, 128>}, {pipeline_mode = #tpu.pipeline_mode<synchronous>, transform_indices = @transform_2, window_bounds = array<i64: 1, 128>}, {pipeline_mode = #tpu.pipeline_mode<synchronous>, transform_indices = @transform_3, window_bounds = array<i64: 128, 128>}, {pipeline_mode = #tpu.pipeline_mode<synchronous>, transform_indices = @transform_4, window_bounds = array<i64: 1, 128>}, {pipeline_mode = #tpu.pipeline_mode<synchronous>, transform_indices = @transform_5, window_bounds = array<i64: 128, 128>}, {pipeline_mode = #tpu.pipeline_mode<synchronous>, transform_indices = @transform_6, window_bounds = array<i64: 1, 128>}, {transform_indices = @transform_7, window_bounds = array<i64: 512, 128>}]} {
    %c0 = arith.constant 0 : index
    %c0_0 = arith.constant 0 : index
    %0 = vector.load %arg1[%c0, %c0_0] : memref<512x128xbf16, #tpu.memory_space<vmem>>, vector<512x128xbf16>
    %c0_1 = arith.constant 0 : index
    %c0_2 = arith.constant 0 : index
    %1 = vector.load %arg2[%c0_1, %c0_2] : memref<128x128xbf16, #tpu.memory_space<vmem>>, vector<128x128xbf16>
    %cst = arith.constant dense<0.000000e+00> : vector<512x128xf32>
    %2 = tpu.matmul %0, %1, %cst {dimension_numbers = #tpu.dot_dimension_numbers<[1], [0], [0], [1], [0, 0, 1, 1], [], []>} : vector<512x128xbf16>, vector<128x128xbf16>, vector<512x128xf32> -> vector<512x128xf32>
    %c0_3 = arith.constant 0 : index
    %c0_4 = arith.constant 0 : index
    %3 = vector.load %arg3[%c0_3, %c0_4] : memref<1x128xf32, #tpu.memory_space<vmem>>, vector<1x128xf32>
    %4 = vector.broadcast %3 : vector<1x128xf32> to vector<512x128xf32>
    %5 = arith.addf %2, %4 : vector<512x128xf32>
    %cst_5 = arith.constant 0.000000e+00 : f32
    %6 = vector.broadcast %cst_5 : f32 to vector<512x128xf32>
    %7 = arith.minimumf %5, %6 : vector<512x128xf32>
    %8 = math.exp %7 : vector<512x128xf32>
    %cst_6 = arith.constant 1.000000e+00 : f32
    %9 = vector.broadcast %cst_6 : f32 to vector<512x128xf32>
    %10 = arith.subf %8, %9 : vector<512x128xf32>
    %cst_7 = arith.constant 1.67326319 : f32
    %11 = vector.broadcast %cst_7 : f32 to vector<512x128xf32>
    %12 = arith.mulf %11, %10 : vector<512x128xf32>
    %cst_8 = arith.constant 0.000000e+00 : f32
    %13 = vector.broadcast %cst_8 : f32 to vector<512x128xf32>
    %14 = arith.cmpf ogt, %5, %13 : vector<512x128xf32>
    %15 = arith.select %14, %5, %12 : vector<512x128xi1>, vector<512x128xf32>
    %cst_9 = arith.constant 1.05070102 : f32
    %16 = vector.broadcast %cst_9 : f32 to vector<512x128xf32>
    %17 = arith.mulf %16, %15 : vector<512x128xf32>
    %18 = arith.truncf %17 : vector<512x128xf32> to vector<512x128xbf16>
    %c0_10 = arith.constant 0 : index
    %c0_11 = arith.constant 0 : index
    %19 = vector.load %arg4[%c0_10, %c0_11] : memref<128x128xbf16, #tpu.memory_space<vmem>>, vector<128x128xbf16>
    %cst_12 = arith.constant dense<0.000000e+00> : vector<512x128xf32>
    %20 = tpu.matmul %18, %19, %cst_12 {dimension_numbers = #tpu.dot_dimension_numbers<[1], [0], [0], [1], [0, 0, 1, 1], [], []>} : vector<512x128xbf16>, vector<128x128xbf16>, vector<512x128xf32> -> vector<512x128xf32>
    %c0_13 = arith.constant 0 : index
    %c0_14 = arith.constant 0 : index
    %21 = vector.load %arg5[%c0_13, %c0_14] : memref<1x128xf32, #tpu.memory_space<vmem>>, vector<1x128xf32>
    %22 = vector.broadcast %21 : vector<1x128xf32> to vector<512x128xf32>
    %23 = arith.addf %20, %22 : vector<512x128xf32>
    %24 = math.tanh %23 : vector<512x128xf32>
    %25 = arith.truncf %24 : vector<512x128xf32> to vector<512x128xbf16>
    %c0_15 = arith.constant 0 : index
    %c0_16 = arith.constant 0 : index
    %26 = vector.load %arg6[%c0_15, %c0_16] : memref<128x128xbf16, #tpu.memory_space<vmem>>, vector<128x128xbf16>
    %cst_17 = arith.constant dense<0.000000e+00> : vector<512x128xf32>
    %27 = tpu.matmul %25, %26, %cst_17 {dimension_numbers = #tpu.dot_dimension_numbers<[1], [0], [0], [1], [0, 0, 1, 1], [], []>} : vector<512x128xbf16>, vector<128x128xbf16>, vector<512x128xf32> -> vector<512x128xf32>
    %c0_18 = arith.constant 0 : index
    %c0_19 = arith.constant 0 : index
    %28 = vector.load %arg7[%c0_18, %c0_19] : memref<1x128xf32, #tpu.memory_space<vmem>>, vector<1x128xf32>
    %29 = vector.broadcast %28 : vector<1x128xf32> to vector<512x128xf32>
    %30 = arith.addf %27, %29 : vector<512x128xf32>
    %c0_20 = arith.constant 0 : index
    %c0_21 = arith.constant 0 : index
    %31 = vector.load %arg8[%c0_20, %c0_21] : memref<512x128xf32, #tpu.memory_space<vmem>>, vector<512x128xf32>
    tpu.vector_store %arg8[%c0_20, %c0_21], %30 {strides = array<i32>} : memref<512x128xf32, #tpu.memory_space<vmem>>, vector<512x128xf32>,
    return
  }
  func.func @transform_0(%arg0: i32) -> (i32, i32) {
    %c0_i32 = arith.constant 0 : i32
    %c0_i32_0 = arith.constant 0 : i32
    return %arg0, %c0_i32 : i32, i32
  }
  func.func @transform_1(%arg0: i32) -> (i32, i32) {
    %c0_i32 = arith.constant 0 : i32
    %c0_i32_0 = arith.constant 0 : i32
    %c0_i32_1 = arith.constant 0 : i32
    return %c0_i32, %c0_i32_0 : i32, i32
  }
  func.func @transform_2(%arg0: i32) -> (i32, i32) {
    %c0_i32 = arith.constant 0 : i32
    %c0_i32_0 = arith.constant 0 : i32
    %c0_i32_1 = arith.constant 0 : i32
    return %c0_i32, %c0_i32_0 : i32, i32
  }
  func.func @transform_3(%arg0: i32) -> (i32, i32) {
    %c0_i32 = arith.constant 0 : i32
    %c0_i32_0 = arith.constant 0 : i32
    %c0_i32_1 = arith.constant 0 : i32
    return %c0_i32, %c0_i32_0 : i32, i32
  }
  func.func @transform_4(%arg0: i32) -> (i32, i32) {
    %c0_i32 = arith.constant 0 : i32
    %c0_i32_0 = arith.constant 0 : i32
    %c0_i32_1 = arith.constant 0 : i32
    return %c0_i32, %c0_i32_0 : i32, i32
  }
  func.func @transform_5(%arg0: i32) -> (i32, i32) {
    %c0_i32 = arith.constant 0 : i32
    %c0_i32_0 = arith.constant 0 : i32
    %c0_i32_1 = arith.constant 0 : i32
    return %c0_i32, %c0_i32_0 : i32, i32
  }
  func.func @transform_6(%arg0: i32) -> (i32, i32) {
    %c0_i32 = arith.constant 0 : i32
    %c0_i32_0 = arith.constant 0 : i32
    %c0_i32_1 = arith.constant 0 : i32
    return %c0_i32, %c0_i32_0 : i32, i32
  }
  func.func @transform_7(%arg0: i32) -> (i32, i32) {
    %c0_i32 = arith.constant 0 : i32
    %c0_i32_0 = arith.constant 0 : i32
    return %arg0, %c0_i32 : i32, i32
  }
}

</mosaic_0001>

<bundles_post_ra>
// kernel: squeeze.1
= control target key start
LH: loop header
LB: loop body
LE: loop exit
PB: predicated region body
PF: predicated region fallthrough
CT: control target
= control target key end

     0   :  { %s64_s10 = smov 3  ;;  %vm22_vm0 = vcmask 48128   ;;  %vm66_vm1 = vcmask 146432   ;;  %s42_s11 = smov 3  ;;  %vm44_vm2 = vcmask 97280   ;;  %vm12_vm3 = vcmask 998400   ;;  %s154_s0 = inlined_call_operand.vmem [shape: s32[4,250], index: 0, kind: input, shape index: {}]   ;;  %s155_s1 = inlined_call_operand.vmem [shape: s32[1000], index: 1, kind: output, shape index: {}]  }
   0x1   :  { %v8_v0 = vld [vmem:[%s154_s0] sm:$0xf]  ;;  %v83_v1 = vld [vmem:[%s154_s0 + $0x4] sm:$0xf]  ;;  %s20_s0 = smov 3  ;;  %s97_s12 = smov 122  }
   0x2   :  { %9 = vst [vmem:[#allocation0] sm:$0xf] %v8_v0  ;;  %7 = vst [vmem:[#allocation0 + $0x8] sm:$0xf] %v83_v1  ;;  %s98_s17 = smov 110   ;;  %s99_s18 = smov 116  }
   0x3   :  { %vm26_vm4 = vcmask 949248   ;;  %vm29_vm5 = vcmask 1048528   ;;  %vm70_vm6 = vcmask 850944   ;;  %vm48_vm7 = vcmask 900096  }
   0x4   :  { %vm51_vm8 = vcmask 1048480   ;;  %vm73_vm9 = vcmask 1048432  }
   0x9   :  { %v33_v2 = vld [vmem:[#allocation0 + $0x1] sm:$0x1]   ;;  %v15_v3 = vld [vmem:[#allocation0] sm:$0x1]   ;;  %v18_v4 = vld [vmem:[#allocation0 + $0x9] sm:$0x1]  }
   0xa   :  { %34 = vrot.lane.b32.xlu1 %v33_v2, %s97_s12  ;;  %16 = vst [vmem:[%s155_s1] sm:$0x1] %v15_v3   ;;  %v21_v5 = vld [vmem:[#allocation0 + $0x1] ss:$8 sm:%s20_s0]   ;;  %v62_v6 = vld [vmem:[#allocation0 + $0xb] sm:$0x1]  }
   0xb   :  { %v65_v7 = vld [vmem:[#allocation0 + $0x3] ss:$8 sm:%s64_s10]   ;;  %v23_v8 = vsel %vm22_vm0, %v21_v5, %v18_v4  ;;  %v40_v10 = vld [vmem:[#allocation0 + $0xa] sm:$0x1]   ;;  %v11_v12 = vld [vmem:[#allocation0 + $0x8] sm:$0x1]  }
   0xc   :  { %v67_v9 = vsel %vm66_vm1, %v65_v7, %v62_v6  ;;  %v43_v11 = vld [vmem:[#allocation0 + $0x2] ss:$8 sm:%s42_s11]   ;;  %24 = vrot.lane.b32.xlu0 %v23_v8, %s97_s12  ;;  %84 = vst.msk [vmem:[%s155_s1 + $0x1] sm:$0x1] %vm12_vm3, %v11_v12   ;;  %v77_v14 = vld [vmem:[#allocation0 + $0x3] sm:$0x1]  }
   0xd   :  { %v45_v13 = vsel %vm44_vm2, %v43_v11, %v40_v10  ;;  %v55_v15 = vld [vmem:[#allocation0 + $0x2] sm:$0x1]  }
   0xe   :  { %68 = vrot.lane.b32.xlu1 %v67_v9, %s98_s17 }
  0x10   :  { %46 = vrot.lane.b32.xlu0 %v45_v13, %s99_s18 }
  0x12   :  { %78 = vrot.lane.b32.xlu1 %v77_v14, %s98_s17 }
  0x14   :  { %56 = vrot.lane.b32.xlu0 %v55_v15, %s99_s18 }
  0x7c   :  { %v35_v16 = vpop.permute.xlu1 %34  }
  0x7e   :  { %v25_v17 = vpop.permute.xlu0 %24  }
  0x7f   :  { %85 = vst.msk [vmem:[%s155_s1 + $0x3] sm:$0x1] %vm26_vm4, %v25_v17  }
  0x80   :  { %86 = vst.msk [vmem:[%s155_s1 + $0x1] sm:$0x3] %vm29_vm5, %v25_v17   ;;  %v69_v18 = vpop.permute.xlu1 %68  }
  0x81   :  { %87 = vst.msk [vmem:[%s155_s1 + $0x2] sm:$0x1] %vm12_vm3, %v35_v16  }
  0x82   :  { %91 = vst.msk [vmem:[%s155_s1 + $0x7] sm:$0x1] %vm70_vm6, %v69_v18   ;;  %v47_v19 = vpop.permute.xlu0 %46  }
  0x83   :  { %88 = vst.msk [vmem:[%s155_s1 + $0x5] sm:$0x1] %vm48_vm7, %v47_v19  }
  0x84   :  { %89 = vst.msk [vmem:[%s155_s1 + $0x3] sm:$0x3] %vm51_vm8, %v47_v19   ;;  %v79_v20 = vpop.permute.xlu1 %78  }
  0x85   :  { %92 = vst.msk [vmem:[%s155_s1 + $0x5] sm:$0x3] %vm73_vm9, %v69_v18  }
  0x86   :  { %93 = vst.msk [vmem:[%s155_s1 + $0x6] sm:$0x1] %vm48_vm7, %v79_v20   ;;  %v57_v21 = vpop.permute.xlu0 %56  }
  0x87   :  { %90 = vst.msk [vmem:[%s155_s1 + $0x4] sm:$0x1] %vm26_vm4, %v57_v21  }

// kernel: gptj_tagger_forward.1
= control target key start
LH: loop header
LB: loop body
LE: loop exit
PB: predicated region body
PF: predicated region fallthrough
CT: control target
= control target key end

     0   :  { %s3258_s24 = smov 0   ;;  %s4359_s0 = inlined_call_operand.vmem [shape: bf16[1024,128], index: 0, kind: input, shape index: {}]   ;;  %s4360_s1 = inlined_call_operand.vmem [shape: bf16[128,128], index: 1, kind: input, shape index: {}]   ;;  %s4361_s2 = inlined_call_operand.vmem [shape: f32[1,128], index: 2, kind: input, shape index: {}]   ;;  %s4362_s3 = inlined_call_operand.vmem [shape: bf16[128,128], index: 3, kind: input, shape index: {}]   ;;  %s4363_s4 = inlined_call_operand.vmem [shape: f32[1,128], index: 4, kind: input, shape index: {}]   ;;  %s4364_s5 = inlined_call_operand.vmem [shape: bf16[128,128], index: 5, kind: input, shape index: {}]   ;;  %s4365_s6 = inlined_call_operand.vmem [shape: f32[1,128], index: 6, kind: input, shape index: {}]   ;;  %s4366_s7 = inlined_call_operand.vmem [shape: f32[1024,128], index: 7, kind: output, shape index: {}]  }
   0x1 LB: > { %s2379_s25 = sadd.s32 4294967295, %s3216_s24   ;;  %p2383_p0 = scmp.ge.s32.totalorder %s3216_s24, 1  ;;  %s3216_s24 = sphi %s3258_s24, %s17_s24  }
   0x2   : > { %p238_p1 = scmp.lt.s32.totalorder %s3216_s24, 3 }
   0x4   : > { %p239_p2 = pnand %p2383_p0, %p238_p1 }
   0x6   : > { %242 = sbr.rel (%p239_p2) target bundleno = 897 (0x381), region = 48 }
   0xd   : > { %v2897_v0 = vld [vmem:[%s4360_s1] sm:$0xff]   ;;  %s2384_s28 = sshll.u32 %s2379_s25, 6  ;;  %v2898_v1 = vld [vmem:[%s4360_s1 + $0x8] sm:$0xff]   ;;  %v2899_v2 = vld [vmem:[%s4360_s1 + $0x10] sm:$0xff]  }
   0xe   : > { %p271_p3 = scmp.lt.s32.totalorder %s2384_s28, 127  ;;  %2633 = vmatprep.subr.bf16.mxu0 %v2897_v0  ;;  %2873 = vmatprep.subr.bf16.mxu1 %v2897_v0  ;;  %v2900_v3 = vld [vmem:[%s4360_s1 + $0x18] sm:$0xff]   ;;  %v2901_v5 = vld [vmem:[%s4360_s1 + $0x20] sm:$0xff]   ;;  %v2902_v6 = vld [vmem:[%s4360_s1 + $0x28] sm:$0xff]  }
   0xf   : > { %2634 = vmatpush3.bf16.msra.mxu0 %v2897_v0  ;;  %2881 = vmatpush3.bf16.msra.mxu1 %v2897_v0  ;;  %v2903_v7 = vld [vmem:[%s4360_s1 + $0x30] sm:$0xff]   ;;  %v2904_v9 = vld [vmem:[%s4360_s1 + $0x38] sm:$0xff]   ;;  %v2937_v18 = vld [vmem:[%s4362_s3] sm:$0xff]  }
  0x10   : > { %s4394_s28 = smov (!%p271_p3, %s2384_s28), 127  ;;  %2635 = vmatprep.subr.bf16.mxu0 %v2898_v1  ;;  %2874 = vmatprep.subr.bf16.mxu1 %v2898_v1  ;;  %v2938_v19 = vld [vmem:[%s4362_s3 + $0x8] sm:$0xff]   ;;  %v2939_v24 = vld [vmem:[%s4362_s3 + $0x10] sm:$0xff]   ;;  %v2940_v25 = vld [vmem:[%s4362_s3 + $0x18] sm:$0xff]  }
  0x11   : > { %s2385_s10 = sshll.u32 %s4394_s28, 2  ;;  %v2941_v30 = vld [vmem:[%s4362_s3 + $0x20] sm:$0xff]   ;;  %v2942_v45 = vld [vmem:[%s4362_s3 + $0x28] sm:$0xff]   ;;  %v2943_v46 = vld [vmem:[%s4362_s3 + $0x30] sm:$0xff]   ;;  %s2387_s20 = sshll.u32 %s4394_s28, 3 }
  0x12   : > { %s3281_s13 = scalar_lea.vmem %s4359_s0, %s2385_s10  ;;  %v2944_v47 = vld [vmem:[%s4362_s3 + $0x38] sm:$0xff]   ;;  %v3357_v48 = vld [vmem:[%s4361_s2] ss:$0 sm:$0xff]  ;;  %s4226_s26 = scalar_lea.vmem %s4366_s7, %s2387_s20 }
  0x13   : > { %2636 = vmatpush3.bf16.msra.mxu0 %v2898_v1  ;;  %2882 = vmatpush3.bf16.msra.mxu1 %v2898_v1  ;;  %v2905_v4 = vld [vmem:[%s3281_s13] sm:$0xff]   ;;  %v2906_v10 = vld [vmem:[%s3281_s13 + $0x8] sm:$0xff]   ;;  %v2907_v11 = vld [vmem:[%s3281_s13 + $0x10] sm:$0xff]  }
  0x14   : > { %2637 = vmatprep.subr.bf16.mxu0 %v2899_v2  ;;  %2875 = vmatprep.subr.bf16.mxu1 %v2899_v2  ;;  %v2917_v8 = vld [vmem:[%s3281_s13 + $0x80] sm:$0xff]   ;;  %v2918_v12 = vld [vmem:[%s3281_s13 + $0x88] sm:$0xff]   ;;  %v2921_v13 = vld [vmem:[%s3281_s13 + $0x90] sm:$0xff]  }
  0x15   : > { %2649 = vmatprep.mubr.bf16.mxu0 %v2905_v4  ;;  %2681 = vmatprep.mubr.bf16.mxu1 %v2917_v8  ;;  %v2908_v14 = vld [vmem:[%s3281_s13 + $0x18] sm:$0xff]   ;;  %v2909_v15 = vld [vmem:[%s3281_s13 + $0x20] sm:$0xff]   ;;  %v2910_v20 = vld [vmem:[%s3281_s13 + $0x28] sm:$0xff]  }
  0x16   : > { %v2922_v16 = vld [vmem:[%s3281_s13 + $0x98] sm:$0xff]   ;;  %v2925_v17 = vld [vmem:[%s3281_s13 + $0xa0] sm:$0xff]   ;;  %v2926_v21 = vld [vmem:[%s3281_s13 + $0xa8] sm:$0xff]  }
  0x17   : > { %2638 = vmatpush3.bf16.msra.mxu0 %v2899_v2  ;;  %2883 = vmatpush3.bf16.msra.mxu1 %v2899_v2  ;;  %v2911_v22 = vld [vmem:[%s3281_s13 + $0x30] sm:$0xff]   ;;  %v2912_v26 = vld [vmem:[%s3281_s13 + $0x38] sm:$0xff]   ;;  %v2913_v28 = vld [vmem:[%s3281_s13 + $0x40] sm:$0xff]  }
  0x18   : > { %2639 = vmatprep.subr.bf16.mxu0 %v2900_v3  ;;  %2876 = vmatprep.subr.bf16.mxu1 %v2900_v3  ;;  %v2927_v23 = vld [vmem:[%s3281_s13 + $0xb0] sm:$0xff]   ;;  %v2928_v27 = vld [vmem:[%s3281_s13 + $0xb8] sm:$0xff]   ;;  %v2929_v29 = vld [vmem:[%s3281_s13 + $0xc0] sm:$0xff]  }
  0x19   : > { %v2914_v31 = vld [vmem:[%s3281_s13 + $0x48] sm:$0xff]   ;;  %v2915_v33 = vld [vmem:[%s3281_s13 + $0x50] sm:$0xff]   ;;  %v2916_v35 = vld [vmem:[%s3281_s13 + $0x58] sm:$0xff]  }
  0x1a   : > { %v2930_v32 = vld [vmem:[%s3281_s13 + $0xc8] sm:$0xff]   ;;  %v2931_v34 = vld [vmem:[%s3281_s13 + $0xd0] sm:$0xff]   ;;  %v2932_v36 = vld [vmem:[%s3281_s13 + $0xd8] sm:$0xff]  }
  0x1b   : > { %2640 = vmatpush3.bf16.msra.mxu0 %v2900_v3  ;;  %2884 = vmatpush3.bf16.msra.mxu1 %v2900_v3  ;;  %v2919_v37 = vld [vmem:[%s3281_s13 + $0x60] sm:$0xff]   ;;  %v2920_v39 = vld [vmem:[%s3281_s13 + $0x68] sm:$0xff]   ;;  %v2923_v41 = vld [vmem:[%s3281_s13 + $0x70] sm:$0xff]  }
  0x1c   : > { %2641 = vmatprep.subr.bf16.mxu0 %v2901_v5  ;;  %2877 = vmatprep.subr.bf16.mxu1 %v2901_v5  ;;  %v2933_v38 = vld [vmem:[%s3281_s13 + $0xe0] sm:$0xff]   ;;  %v2934_v40 = vld [vmem:[%s3281_s13 + $0xe8] sm:$0xff]   ;;  %v2935_v42 = vld [vmem:[%s3281_s13 + $0xf0] sm:$0xff]  }
  0x1d   : > { %v2924_v43 = vld [vmem:[%s3281_s13 + $0x78] sm:$0xff]  }
  0x1e   : > { %v2936_v44 = vld [vmem:[%s3281_s13 + $0xf8] sm:$0xff]  }
  0x1f   : > { %2642 = vmatpush3.bf16.msra.mxu0 %v2901_v5  ;;  %2885 = vmatpush3.bf16.msra.mxu1 %v2901_v5 }
  0x20   : > { %2643 = vmatprep.subr.bf16.mxu0 %v2902_v6  ;;  %2878 = vmatprep.subr.bf16.mxu1 %v2902_v6 }
  0x23   : > { %2644 = vmatpush3.bf16.msra.mxu0 %v2902_v6  ;;  %2886 = vmatpush3.bf16.msra.mxu1 %v2902_v6 }
  0x24   : > { %2645 = vmatprep.subr.bf16.mxu0 %v2903_v7  ;;  %2879 = vmatprep.subr.bf16.mxu1 %v2903_v7 }
  0x27   : > { %2646 = vmatpush3.bf16.msra.mxu0 %v2903_v7  ;;  %2887 = vmatpush3.bf16.msra.mxu1 %v2903_v7 }
  0x28   : > { %2647 = vmatprep.subr.bf16.mxu0 %v2904_v9  ;;  %2880 = vmatprep.subr.bf16.mxu1 %v2904_v9 }
  0x2b   : > { %2648 = vmatpush3.bf16.msra.mxu0 %v2904_v9  ;;  %2888 = vmatpush3.bf16.msra.mxu1 %v2904_v9 }
  0x2c   : > { %2713 = vmatprep.subr.bf16.mxu1 %v2937_v18 }
  0x2e   : > { %2650 = vmatmul.mubr.bf16.vlgmr.msra.gmra.mrb[0].mxu0 %v2906_v10  ;;  %2682 = vmatmul.mubr.bf16.vlgmr.msra.gmra.mrb[0].mxu1 %v2918_v12 }
  0x2f   : > { %2653 = vmatprep.mubr.bf16.mxu0 %v2907_v11  ;;  %2685 = vmatprep.mubr.bf16.mxu1 %v2921_v13 }
  0x30   : > { %2714 = vmatpush3.bf16.msra.mxu1 %v2937_v18 }
  0x31   : > { %2715 = vmatprep.subr.bf16.mxu1 %v2938_v19 }
  0x34   : > { %2716 = vmatpush3.bf16.msra.mxu1 %v2938_v19 }
  0x35   : > { %2717 = vmatprep.subr.bf16.mxu1 %v2939_v24 }
  0x36   : > { %2654 = vmatmul.mubr.bf16.gmra.mrb[4].mxu0 %v2908_v14  ;;  %2686 = vmatmul.mubr.bf16.gmra.mrb[4].mxu1 %v2922_v16 }
  0x37   : > { %2657 = vmatprep.mubr.bf16.mxu0 %v2909_v15  ;;  %2689 = vmatprep.mubr.bf16.mxu1 %v2925_v17 }
  0x38   : > { %2718 = vmatpush3.bf16.msra.mxu1 %v2939_v24 }
  0x39   : > { %2719 = vmatprep.subr.bf16.mxu1 %v2940_v25 }
  0x3c   : > { %2720 = vmatpush3.bf16.msra.mxu1 %v2940_v25 }
  0x3d   : > { %2721 = vmatprep.subr.bf16.mxu1 %v2941_v30 }
  0x3e   : > { %2658 = vmatmul.mubr.bf16.gmra.mrb[8].mxu0 %v2910_v20  ;;  %2690 = vmatmul.mubr.bf16.gmra.mrb[8].mxu1 %v2926_v21 }
  0x3f   : > { %2661 = vmatprep.mubr.bf16.mxu0 %v2911_v22  ;;  %2693 = vmatprep.mubr.bf16.mxu1 %v2927_v23 }
  0x40   : > { %2722 = vmatpush3.bf16.msra.mxu1 %v2941_v30 }
  0x41   : > { %2723 = vmatprep.subr.bf16.mxu1 %v2942_v45 }
  0x44   : > { %2724 = vmatpush3.bf16.msra.mxu1 %v2942_v45 }
  0x45   : > { %2725 = vmatprep.subr.bf16.mxu1 %v2943_v46 }
  0x46   : > { %2662 = vmatmul.mubr.bf16.gmra.mrb[12].mxu0 %v2912_v26  ;;  %2694 = vmatmul.mubr.bf16.gmra.mrb[12].mxu1 %v2928_v27 }
  0x47   : > { %2665 = vmatprep.mubr.bf16.mxu0 %v2913_v28  ;;  %2697 = vmatprep.mubr.bf16.mxu1 %v2929_v29 }
  0x48   : > { %2726 = vmatpush3.bf16.msra.mxu1 %v2943_v46 }
  0x49   : > { %2727 = vmatprep.subr.bf16.mxu1 %v2944_v47 }
  0x4c   : > { %2728 = vmatpush3.bf16.msra.mxu1 %v2944_v47 }
  0x4e   : > { %2666 = vmatmul.mubr.bf16.gmra.mrb[16].mxu0 %v2914_v31  ;;  %2698 = vmatmul.mubr.bf16.gmra.mrb[16].mxu1 %v2930_v32 }
  0x4f   : > { %2669 = vmatprep.mubr.bf16.mxu0 %v2915_v33  ;;  %2701 = vmatprep.mubr.bf16.mxu1 %v2931_v34 }
  0x56   : > { %2670 = vmatmul.mubr.bf16.gmra.mrb[20].mxu0 %v2916_v35  ;;  %2702 = vmatmul.mubr.bf16.gmra.mrb[20].mxu1 %v2932_v36 }
  0x57   : > { %2673 = vmatprep.mubr.bf16.mxu0 %v2919_v37  ;;  %2705 = vmatprep.mubr.bf16.mxu1 %v2933_v38 }
  0x5e   : > { %2674 = vmatmul.mubr.bf16.gmra.mrb[24].mxu0 %v2920_v39  ;;  %2706 = vmatmul.mubr.bf16.gmra.mrb[24].mxu1 %v2934_v40 }
  0x5f   : > { %2677 = vmatprep.mubr.bf16.mxu0 %v2923_v41  ;;  %2709 = vmatprep.mubr.bf16.mxu1 %v2935_v42 }
  0x66   : > { %2678 = vmatmul.mubr.bf16.gmra.mrb[28].mxu0 %v2924_v43  ;;  %2710 = vmatmul.mubr.bf16.gmra.mrb[28].mxu1 %v2936_v44 }
 0x101   : > { %v2651_v49 = vpop.f32.mrb[0].mxu0  ;;  %v2683_v50 = vpop.f32.mrb[0].mxu1 }
 0x102   : > { %v3360_v51 = vadd.f32 %v2651_v49, %v3357_v48  ;;  %v644_v52 = vpop.f32.mrb[1].mxu0  ;;  %v772_v53 = vpop.f32.mrb[1].mxu1  ;;  %v3403_v21 = vadd.f32 %v2683_v50, %v3357_v48 }
 0x103   : > { %v3363_v54 = vadd.f32 %v3357_v48, %v644_v52  ;;  %v2652_v55 = vpop.f32.mrb[2].mxu0  ;;  %v3365_v56 = vpop.f32.mrb[2].mxu1  ;;  %v3415_v36 = vadd.f32 %v3357_v48, %v772_v53 }
 0x104   : > { %v901_v57 = vmin.f32 %v3360_v51, 0.0  ;;  %v3369_v58 = vadd.f32 %v2652_v55, %v3357_v48  ;;  %v647_v59 = vpop.f32.mrb[3].mxu0  ;;  %v3371_v60 = vpop.f32.mrb[3].mxu1  ;;  %v933_v31 = vmin.f32 %v3403_v21, 0.0  ;;  %vm1221_vm0 = vcmp.gt.f32.partialorder %v3360_v51, 0.0 }
 0x105   : > { %v899_v61 = vmin.f32 %v3363_v54, 0.0  ;;  %v3375_v62 = vadd.f32 %v3357_v48, %v647_v59  ;;  %vm1219_vm1 = vcmp.gt.f32.partialorder %v3363_v54, 0.0  ;;  %vm1253_vm15 = vcmp.gt.f32.partialorder %v3403_v21, 0.0 }
 0x106   : > { %v967_v63 = vmul.f32 1.442695, %v901_v57  ;;  %v902_v0 = vmin.f32 %v3369_v58, 0.0  ;;  %vm1222_vm2 = vcmp.gt.f32.partialorder %v3369_v58, 0.0  ;;  %v3431_v50 = vmul.f32 1.442695, %v933_v31 }
 0x107   : > { %v963_v1 = vmul.f32 1.442695, %v899_v61  ;;  %v900_v2 = vmin.f32 %v3375_v62, 0.0  ;;  %v931_v57 = vmin.f32 %v3415_v36, 0.0  ;;  %vm1220_vm3 = vcmp.gt.f32.partialorder %v3375_v62, 0.0 }
 0x108   : > { %2953 = vpow2.f32 %v967_v63  ;;  %v969_v3 = vmul.f32 1.442695, %v902_v0  ;;  %v3440_v63 = vadd.f32 %v3365_v56, %v3357_v48 }
 0x109   : > { %2955 = vpow2.f32 %v963_v1  ;;  %v965_v4 = vmul.f32 1.442695, %v900_v2  ;;  %v2655_v5 = vpop.f32.mrb[4].mxu0  ;;  %v3379_v6 = vpop.f32.mrb[4].mxu1 }
 0x10a   : > { %2957 = vpow2.f32 %v969_v3  ;;  %v3382_v7 = vadd.f32 %v2655_v5, %v3357_v48  ;;  %v660_v8 = vpop.f32.mrb[5].mxu0  ;;  %v3384_v9 = vpop.f32.mrb[5].mxu1  ;;  %v934_v31 = vmin.f32 %v3440_v63, 0.0 }
 0x10b   : > { %2959 = vpow2.f32 %v965_v4  ;;  %v3387_v10 = vadd.f32 %v3357_v48, %v660_v8  ;;  %v2656_v11 = vpop.f32.mrb[6].mxu0  ;;  %v3389_v12 = vpop.f32.mrb[6].mxu1 }
 0x10c   : > { %v905_v13 = vmin.f32 %v3382_v7, 0.0  ;;  %v3393_v14 = vadd.f32 %v2656_v11, %v3357_v48  ;;  %v663_v15 = vpop.f32.mrb[7].mxu0  ;;  %v3395_v16 = vpop.f32.mrb[7].mxu1  ;;  %vm1225_vm4 = vcmp.gt.f32.partialorder %v3382_v7, 0.0 }
 0x10d   : > { %v903_v17 = vmin.f32 %v3387_v10, 0.0  ;;  %v3399_v18 = vadd.f32 %v3357_v48, %v663_v15  ;;  %vm1223_vm7 = vcmp.gt.f32.partialorder %v3387_v10, 0.0 }
 0x10e   : > { %v975_v19 = vmul.f32 1.442695, %v905_v13  ;;  %v906_v20 = vmin.f32 %v3393_v14, 0.0  ;;  %vm1226_vm5 = vcmp.gt.f32.partialorder %v3393_v14, 0.0 }
 0x10f   : > { %v971_v22 = vmul.f32 1.442695, %v903_v17  ;;  %v904_v23 = vmin.f32 %v3399_v18, 0.0  ;;  %vm1224_vm6 = vcmp.gt.f32.partialorder %v3399_v18, 0.0 }
 0x110   : > { %2961 = vpow2.f32 %v975_v19  ;;  %v977_v24 = vmul.f32 1.442695, %v906_v20 }
 0x111   : > { %2963 = vpow2.f32 %v971_v22  ;;  %v973_v25 = vmul.f32 1.442695, %v904_v23  ;;  %v2659_v26 = vpop.f32.mrb[8].mxu0  ;;  %v3406_v27 = vpop.f32.mrb[8].mxu1  ;;  %v3464_v22 = vmul.f32 1.442695, %v931_v57 }
 0x112   : > { %v2954_v28 = vpop.eup %2953  ;;  %2965 = vpow2.f32 %v977_v24  ;;  %v3409_v29 = vadd.f32 %v2659_v26, %v3357_v48  ;;  %v676_v30 = vpop.f32.mrb[9].mxu0 }
 0x113   : > { %v3412_v32 = vpop.f32.mrb[9].mxu1  ;;  %v2956_v33 = vpop.eup %2955  ;;  %v2431_v34 = vadd.f32 -1.0, %v2954_v28  ;;  %2967 = vpow2.f32 %v973_v25  ;;  %v3421_v39 = vadd.f32 %v3357_v48, %v676_v30 }
 0x114   : > { %v2660_v35 = vpop.f32.mrb[10].mxu0  ;;  %v3417_v37 = vpop.f32.mrb[10].mxu1  ;;  %v2429_v45 = vadd.f32 -1.0, %v2956_v33  ;;  %v909_v47 = vmin.f32 %v3409_v29, 0.0  ;;  %vm1229_vm8 = vcmp.gt.f32.partialorder %v3409_v29, 0.0 }
 0x115   : > { %v2958_v38 = vpop.eup %2957  ;;  %v3424_v40 = vadd.f32 %v2660_v35, %v3357_v48  ;;  %v679_v41 = vpop.f32.mrb[11].mxu0  ;;  %v1157_v44 = vmul.f32 1.6732632, %v2431_v34  ;;  %v907_v61 = vmin.f32 %v3421_v39, 0.0  ;;  %vm1227_vm9 = vcmp.gt.f32.partialorder %v3421_v39, 0.0 }
 0x116   : > { %v3426_v42 = vpop.f32.mrb[11].mxu1  ;;  %v2960_v43 = vpop.eup %2959  ;;  %v2432_v46 = vadd.f32 -1.0, %v2958_v38  ;;  %v1155_v0 = vmul.f32 1.6732632, %v2429_v45  ;;  %v983_v2 = vmul.f32 1.442695, %v909_v47  ;;  %v3454_v13 = vadd.f32 %v3357_v48, %v679_v41 }
 0x117   : > { %v2430_v49 = vadd.f32 -1.0, %v2960_v43  ;;  %v1285_v52 = vsel %vm1221_vm0, %v3360_v51, %v1157_v44  ;;  %v910_v55 = vmin.f32 %v3424_v40, 0.0  ;;  %v3445_v51 = vadd.f32 %v3357_v48, %v3371_v60 }
 0x118   : > { %v1158_v53 = vmul.f32 1.6732632, %v2432_v46  ;;  %v3449_v8 = vmul.f32 1.050701, %v1285_v52  ;;  %v908_v28 = vmin.f32 %v3454_v13, 0.0  ;;  %v1283_v35 = vsel %vm1219_vm1, %v3363_v54, %v1155_v0 }
 0x119   : > { %v1156_v59 = vmul.f32 1.6732632, %v2430_v49  ;;  %v2663_v3 = vpop.f32.mrb[12].mxu0  ;;  %v3447_v4 = vpop.f32.mrb[12].mxu1  ;;  %v985_v19 = vmul.f32 1.442695, %v910_v55  ;;  %2969 = vpow2.f32 %v983_v2 }
 0x11a   : > { %v1286_v1 = vsel %vm1222_vm2, %v3369_v58, %v1158_v53  ;;  %v2962_v5 = vpop.eup %2961  ;;  %v3457_v56 = vadd.f32 %v2663_v3, %v3357_v48  ;;  %v692_v58 = vpop.f32.mrb[13].mxu0  ;;  %v979_v38 = vmul.f32 1.442695, %v907_v61  ;;  %v932_v43 = vmin.f32 %v3445_v51, 0.0 }
 0x11b   : > { %v3451_v11 = vmul.f32 1.050701, %v1286_v1  ;;  %v3459_v15 = vpop.f32.mrb[13].mxu1  ;;  %v2964_v17 = vpop.eup %2963  ;;  %v3462_v60 = vadd.f32 %v3357_v48, %v692_v58  ;;  %v1284_v26 = vsel %vm1220_vm3, %v3375_v62, %v1156_v59  ;;  %v981_v62 = vmul.f32 1.442695, %v908_v28 }
 0x11c   : > { %v2664_v20 = vpop.f32.mrb[14].mxu0  ;;  %v3466_v23 = vpop.f32.mrb[14].mxu1  ;;  %v913_v41 = vmin.f32 %v3457_v56, 0.0  ;;  %v1348_v46 = vmul.f32 1.050701, %v1284_v26  ;;  %v2433_v47 = vadd.f32 -1.0, %v2964_v17  ;;  %2971 = vpow2.f32 %v985_v19 }
 0x11d   : > { %v2966_v24 = vpop.eup %2965  ;;  %v1412_v25 = vpack.c.bf16 %v3451_v11, %v3449_v8  ;;  %v695_v30 = vpop.f32.mrb[15].mxu0  ;;  %v911_v49 = vmin.f32 %v3462_v60, 0.0  ;;  %v1347_v52 = vmul.f32 1.050701, %v1283_v35  ;;  %v2435_v53 = vadd.f32 -1.0, %v2962_v5 }
 0x11e   : > { %v3475_v33 = vpop.f32.mrb[15].mxu1  ;;  %v2968_v34 = vpop.eup %2967  ;;  %v2436_v44 = vadd.f32 -1.0, %v2966_v24  ;;  %2973 = vpow2.f32 %v981_v62  ;;  %v991_v55 = vmul.f32 1.442695, %v913_v41  ;;  %v3489_v0 = vadd.f32 %v2664_v20, %v3357_v48 }
 0x11f   : > { %v2434_v45 = vadd.f32 -1.0, %v2968_v34  ;;  %2975 = vpow2.f32 %v979_v38  ;;  %v3492_v1 = vadd.f32 %v3357_v48, %v695_v30  ;;  %v1159_v5 = vmul.f32 1.6732632, %v2433_v47 }
 0x120   : > { %v1162_v61 = vmul.f32 1.6732632, %v2436_v44  ;;  %v987_v8 = vmul.f32 1.442695, %v911_v49  ;;  %v1411_v11 = vpack.c.bf16 %v1348_v46, %v1347_v52  ;;  %v1161_v19 = vmul.f32 1.6732632, %v2435_v53 }
 0x121   : > { %v1160_v54 = vmul.f32 1.6732632, %v2434_v45  ;;  %v2667_v57 = vpop.f32.mrb[16].mxu0  ;;  %v3485_v59 = vpop.f32.mrb[16].mxu1  ;;  %v914_v24 = vmin.f32 %v3489_v0, 0.0  ;;  %v912_v26 = vmin.f32 %v3492_v1, 0.0  ;;  %2977 = vpow2.f32 %v3431_v50 }
 0x122   : > { %v708_v2 = vpop.f32.mrb[17].mxu0  ;;  %v3494_v3 = vpop.f32.mrb[17].mxu1  ;;  %2979 = vpow2.f32 %v991_v55  ;;  %2729 = vmatprep.mubr.bf16.mxu1 %v1411_v11  ;;  %v3507_v34 = vadd.f32 %v2667_v57, %v3357_v48  ;;  %v1290_v50 = vsel %vm1226_vm5, %v3393_v14, %v1162_v61  ;;  %v1289_v46 = vsel %vm1225_vm4, %v3382_v7, %v1161_v19 }
 0x123   : > { %4367 = vst [vmem:[#allocation2_spill] sm:$0xff] %v3494_v3  ;;  %v2668_v58 = vpop.f32.mrb[18].mxu0  ;;  %v3496_v17 = vpop.f32.mrb[18].mxu1  ;;  %v1288_v30 = vsel %vm1224_vm6, %v3399_v18, %v1160_v54  ;;  %v3510_v35 = vadd.f32 %v3357_v48, %v708_v2  ;;  %v993_v38 = vmul.f32 1.442695, %v914_v24  ;;  %2730 = vmatmul.mubr.bf16.vlgmr.msra.gmra.mrb[32].mxu1 %v1412_v25  ;;  %v1287_v18 = vsel %vm1223_vm7, %v3387_v10, %v1159_v5 }
 0x124   : > { %4368 = vst [vmem:[#allocation3_spill] sm:$0xff] %v3496_v17  ;;  %v711_v28 = vpop.f32.mrb[19].mxu0  ;;  %v3501_v20 = vpop.f32.mrb[19].mxu1  ;;  %v3517_v41 = vadd.f32 %v2668_v58, %v3357_v48  ;;  %2981 = vpow2.f32 %v987_v8  ;;  %v989_v44 = vmul.f32 1.442695, %v912_v26  ;;  %v917_v45 = vmin.f32 %v3507_v34, 0.0 }
 0x125   : > { %4369 = vst [vmem:[#allocation4_spill] sm:$0xff] %v3501_v20  ;;  %v2970_v62 = vpop.eup %2969  ;;  %v1352_v47 = vmul.f32 1.050701, %v1288_v30  ;;  %2983 = vpow2.f32 %v3464_v22  ;;  %v3525_v14 = vmul.f32 1.442695, %v934_v31  ;;  %v915_v10 = vmin.f32 %v3510_v35, 0.0 }
 0x126   : > { %v2972_v25 = vpop.eup %2971  ;;  %v1354_v49 = vmul.f32 1.050701, %v1290_v50  ;;  %2985 = vpow2.f32 %v993_v38  ;;  %v999_v52 = vmul.f32 1.442695, %v917_v45  ;;  %v1351_v55 = vmul.f32 1.050701, %v1287_v18 }
 0x127   : > { %v918_v57 = vmin.f32 %v3517_v41, 0.0  ;;  %v3531_v7 = vadd.f32 %v3379_v6, %v3357_v48  ;;  %v3535_v22 = vadd.f32 %v3357_v48, %v3384_v9  ;;  %v1353_v5 = vmul.f32 1.050701, %v1289_v46 }
 0x128   : > { %v2974_v54 = vpop.eup %2973  ;;  %v2439_v8 = vadd.f32 -1.0, %v2970_v62  ;;  %2987 = vpow2.f32 %v989_v44  ;;  %v995_v11 = vmul.f32 1.442695, %v915_v10  ;;  %v3540_v26 = vadd.f32 %v3357_v48, %v711_v28 }
 0x129   : > { %v2671_v53 = vpop.f32.mrb[20].mxu0  ;;  %v3537_v31 = vpop.f32.mrb[20].mxu1  ;;  %v2438_v19 = vadd.f32 -1.0, %v2974_v54  ;;  %v1001_v24 = vmul.f32 1.442695, %v918_v57  ;;  %v1413_v30 = vpack.c.bf16 %v1352_v47, %v1351_v55  ;;  %v2440_v38 = vadd.f32 -1.0, %v2972_v25 }
 0x12a   : > { %v724_v61 = vpop.f32.mrb[21].mxu0  ;;  %4370 = vst [vmem:[#allocation5_spill] sm:$0xff] %v3537_v31  ;;  %v2976_v2 = vpop.eup %2975  ;;  %2989 = vpow2.f32 %v999_v52  ;;  %v1414_v9 = vpack.c.bf16 %v1354_v49, %v1353_v5  ;;  %v3545_v18 = vadd.f32 %v2671_v53, %v3357_v48  ;;  %v3553_v28 = vmul.f32 1.442695, %v932_v43 }
 0x12b   : > { %v2672_v58 = vpop.f32.mrb[22].mxu0  ;;  %v3542_v50 = vpop.f32.mrb[21].mxu1  ;;  %v2437_v62 = vadd.f32 -1.0, %v2976_v2  ;;  %2991 = vpow2.f32 %v995_v11  ;;  %2733 = vmatprep.mubr.bf16.mxu1 %v1413_v30  ;;  %v916_v49 = vmin.f32 %v3540_v26, 0.0  ;;  %vm1230_vm10 = vcmp.gt.f32.partialorder %v3424_v40, 0.0 }
 0x12c   : > { %v727_v6 = vpop.f32.mrb[23].mxu0  ;;  %4371 = vst [vmem:[#allocation6_spill] sm:$0xff] %v3542_v50  ;;  %v3547_v45 = vpop.f32.mrb[22].mxu1  ;;  %2993 = vpow2.f32 %v1001_v24  ;;  %2734 = vmatmul.mubr.bf16.gmra.mrb[36].mxu1 %v1414_v9  ;;  %v1164_v10 = vmul.f32 1.6732632, %v2438_v19  ;;  %v921_v43 = vmin.f32 %v3545_v18, 0.0  ;;  %v3565_v57 = vadd.f32 %v3357_v48, %v724_v61 }
 0x12d   : > { %4372 = vst [vmem:[#allocation7_spill] sm:$0xff] %v3547_v45  ;;  %v3549_v44 = vpop.eup %2977  ;;  %v3556_v47 = vpop.f32.mrb[23].mxu1  ;;  %v1165_v54 = vmul.f32 1.6732632, %v2439_v8  ;;  %v1166_v55 = vmul.f32 1.6732632, %v2440_v38  ;;  %v3568_v2 = vadd.f32 %v2672_v58, %v3357_v48  ;;  %v3581_v8 = vadd.f32 %v3389_v12, %v3357_v48 }
 0x12e   : > { %4373 = vst [vmem:[#allocation8_spill] sm:$0xff] %v3556_v47  ;;  %v2980_v25 = vpop.eup %2979  ;;  %v1163_v30 = vmul.f32 1.6732632, %v2437_v62  ;;  %vm1228_vm11 = vcmp.gt.f32.partialorder %v3454_v13, 0.0  ;;  %vm1233_vm12 = vcmp.gt.f32.partialorder %v3457_v56, 0.0  ;;  %v919_v52 = vmin.f32 %v3565_v57, 0.0 }
 0x12f   : > { %v2982_v53 = vpop.eup %2981  ;;  %v2443_v19 = vadd.f32 -1.0, %v2980_v25  ;;  %v997_v38 = vmul.f32 1.442695, %v916_v49  ;;  %v3588_v46 = vadd.f32 %v3357_v48, %v727_v6  ;;  %v1007_v12 = vmul.f32 1.442695, %v921_v43 }
 0x130   : > { %v3574_v24 = vpop.eup %2983  ;;  %v2441_v47 = vadd.f32 -1.0, %v2982_v53  ;;  %v922_v45 = vmin.f32 %v3568_v2, 0.0  ;;  %v1293_v6 = vsel %vm1229_vm8, %v3409_v29, %v1165_v54  ;;  %v1294_v31 = vsel %vm1230_vm10, %v3424_v40, %v1166_v55 }
 0x131   : > { %v3570_v5 = vpop.f32.mrb[24].mxu0  ;;  %v3572_v11 = vpop.f32.mrb[24].mxu1  ;;  %vm1231_vm13 = vcmp.gt.f32.partialorder %v3462_v60, 0.0  ;;  %vm1234_vm14 = vcmp.gt.f32.partialorder %v3489_v0, 0.0  ;;  %v1003_v53 = vmul.f32 1.442695, %v919_v52  ;;  %2995 = vpow2.f32 %v997_v38 }
 0x132   : > { %4374 = vst [vmem:[#allocation9_spill] sm:$0xff] %v3572_v11  ;;  %v3577_v9 = vpop.f32.mrb[25].mxu0  ;;  %v3583_v61 = vpop.f32.mrb[25].mxu1  ;;  %v1292_v11 = vsel %vm1228_vm11, %v3454_v13, %v1164_v10  ;;  %v1291_v13 = vsel %vm1227_vm9, %v3421_v39, %v1163_v30  ;;  %v1169_v10 = vmul.f32 1.6732632, %v2443_v19  ;;  %v920_v54 = vmin.f32 %v3588_v46, 0.0 }
 0x133   : > { %4375 = vst [vmem:[#allocation10_spill] sm:$0xff] %v3583_v61  ;;  %v2986_v58 = vpop.eup %2985  ;;  %v3590_v62 = vpop.f32.mrb[26].mxu0  ;;  %v1009_v29 = vmul.f32 1.442695, %v922_v45  ;;  %v1357_v55 = vmul.f32 1.050701, %v1293_v6  ;;  %2997 = vpow2.f32 %v1007_v12 }
 0x134   : > { %v3592_v25 = vpop.f32.mrb[26].mxu1  ;;  %v3596_v61 = vpop.f32.mrb[27].mxu0  ;;  %v2444_v43 = vadd.f32 -1.0, %v2986_v58  ;;  %v1358_v20 = vmul.f32 1.050701, %v1294_v31  ;;  %vm1232_vm0 = vcmp.gt.f32.partialorder %v3492_v1, 0.0  ;;  %2999 = vpow2.f32 %v3525_v14 }
 0x135   : > { %4376 = vst [vmem:[#allocation11_spill] sm:$0xff] %v3592_v25  ;;  %v3598_v50 = vpop.f32.mrb[27].mxu1  ;;  %v2988_v49 = vpop.eup %2987  ;;  %v1356_v25 = vmul.f32 1.050701, %v1292_v11  ;;  %v1167_v17 = vmul.f32 1.6732632, %v2441_v47  ;;  %v1297_v45 = vsel %vm1233_vm12, %v3457_v56, %v1169_v10  ;;  %3001 = vpow2.f32 %v1003_v53 }
 0x136   : > { %4377 = vst [vmem:[#allocation12_spill] sm:$0xff] %v3598_v50  ;;  %v2990_v50 = vpop.eup %2989  ;;  %v1355_v39 = vmul.f32 1.050701, %v1291_v13  ;;  %v2442_v30 = vadd.f32 -1.0, %v2988_v49  ;;  %v2463_v52 = vadd.f32 -1.0, %v3549_v44  ;;  %3003 = vpow2.f32 %v1009_v29  ;;  %v2946_v29 = vld [vmem:[%s4364_s5 + $0x8] sm:$0xff]  }
 0x137   : > { %v2992_v40 = vpop.eup %2991  ;;  %v1170_v11 = vmul.f32 1.6732632, %v2444_v43  ;;  %v2447_v58 = vadd.f32 -1.0, %v2990_v50  ;;  %v1005_v38 = vmul.f32 1.442695, %v920_v54  ;;  %vm1251_vm1 = vcmp.gt.f32.partialorder %v3415_v36, 0.0 }
 0x138   : > { %v2994_v3 = vpop.eup %2993  ;;  %v2445_v47 = vadd.f32 -1.0, %v2992_v40  ;;  %v1415_v12 = vpack.c.bf16 %v1356_v25, %v1355_v39  ;;  %v1295_v49 = vsel %vm1231_vm13, %v3462_v60, %v1167_v17  ;;  %vm1237_vm2 = vcmp.gt.f32.partialorder %v3507_v34, 0.0 }
 0x139   : > { %v3616_v19 = vpop.f32.mrb[28].mxu0  ;;  %v3626_v14 = vpop.f32.mrb[28].mxu1  ;;  %v2448_v56 = vadd.f32 -1.0, %v2994_v3  ;;  %v1416_v50 = vpack.c.bf16 %v1358_v20, %v1357_v55  ;;  %v1168_v10 = vmul.f32 1.6732632, %v2442_v30  ;;  %3005 = vpow2.f32 %v3553_v28 }
 0x13a   : > { %v3621_v31 = vpop.f32.mrb[29].mxu0  ;;  %v3634_v13 = vpop.f32.mrb[29].mxu1  ;;  %v1189_v43 = vmul.f32 1.6732632, %v2463_v52  ;;  %2737 = vmatprep.mubr.bf16.mxu1 %v1415_v12  ;;  %v3639_v25 = vadd.f32 %v3570_v5, %v3357_v48  ;;  %v3643_v60 = vmul.f32 1.050701, %v1297_v45  ;;  %v1298_v3 = vsel %vm1234_vm14, %v3489_v0, %v1170_v11 }
 0x13b   : > { %v3624_v44 = vpop.f32.mrb[30].mxu0  ;;  %v3641_v53 = vpop.f32.mrb[30].mxu1  ;;  %v2461_v17 = vadd.f32 -1.0, %v3574_v24  ;;  %2738 = vmatmul.mubr.bf16.gmra.mrb[40].mxu1 %v1416_v50  ;;  %v3651_v20 = vadd.f32 %v3357_v48, %v3577_v9  ;;  %v2945_v5 = vld [vmem:[%s4364_s5] sm:$0xff]   ;;  %v1173_v54 = vmul.f32 1.6732632, %v2447_v58  ;;  %3007 = vpow2.f32 %v1005_v38 }
 0x13c   : > { %v3632_v6 = vpop.f32.mrb[31].mxu0  ;;  %v3653_v28 = vpop.f32.mrb[31].mxu1  ;;  %v1171_v40 = vmul.f32 1.6732632, %v2445_v47  ;;  %v925_v0 = vmin.f32 %v3639_v25, 0.0  ;;  %vm1235_vm3 = vcmp.gt.f32.partialorder %v3510_v35, 0.0  ;;  %2793 = vmatprep.subr.bf16.mxu0 %v2945_v5  ;;  %v1296_v30 = vsel %vm1232_vm0, %v3492_v1, %v1168_v10 }
 0x13d   : > { %4378 = vst [vmem:[#allocation13_spill] sm:$0xff] %v3653_v28  ;;  %v3662_v24 = vmul.f32 1.050701, %v1295_v49  ;;  %v1174_v9 = vmul.f32 1.6732632, %v2448_v56  ;;  %v923_v55 = vmin.f32 %v3651_v20, 0.0  ;;  %v2996_v39 = vpop.eup %2995  ;;  %v1317_v52 = vsel %vm1253_vm15, %v3403_v21, %v1189_v43  ;;  %2794 = vmatpush3.bf16.msra.mxu0 %v2945_v5 }
 0x13e   : > { %v1015_v45 = vmul.f32 1.442695, %v925_v0  ;;  %v3674_v11 = vadd.f32 %v3590_v62, %v3357_v48  ;;  %v2998_v58 = vpop.eup %2997  ;;  %v3676_v47 = vmul.f32 1.050701, %v1298_v3  ;;  %vm1238_vm4 = vcmp.gt.f32.partialorder %v3517_v41, 0.0  ;;  %2795 = vmatprep.subr.bf16.mxu0 %v2946_v29  ;;  %v2947_v21 = vld [vmem:[%s4364_s5 + $0x10] sm:$0xff]  }
 0x13f   : > { %v1187_v38 = vmul.f32 1.6732632, %v2461_v17  ;;  %v3681_v12 = vadd.f32 %v3357_v48, %v3395_v16  ;;  %v3000_v1 = vpop.eup %2999  ;;  %v1301_v62 = vsel %vm1237_vm2, %v3507_v34, %v1173_v54  ;;  %v1299_v49 = vsel %vm1235_vm3, %v3510_v35, %v1171_v40 }
 0x140   : > { %v1011_v56 = vmul.f32 1.442695, %v923_v55  ;;  %v926_v50 = vmin.f32 %v3674_v11, 0.0  ;;  %v3002_v10 = vpop.eup %3001  ;;  %v1360_v16 = vmul.f32 1.050701, %v1296_v30  ;;  %v1302_v43 = vsel %vm1238_vm4, %v3517_v41, %v1174_v9  ;;  %v2948_v55 = vld [vmem:[%s4364_s5 + $0x18] sm:$0xff]  }
 0x141   : > { %v3694_v3 = vmul.f32 1.050701, %v1317_v52  ;;  %v4379_v17 = vmin.f32 %v3531_v7, 0.0  ;;  %v3004_v0 = vpop.eup %3003  ;;  %v2446_v28 = vadd.f32 -1.0, %v2996_v39  ;;  %vm1236_vm5 = vcmp.gt.f32.partialorder %v3540_v26, 0.0  ;;  %2796 = vmatpush3.bf16.msra.mxu0 %v2946_v29 }
 0x142   : > { %vm1254_vm6 = vcmp.gt.f32.partialorder %v3440_v63, 0.0  ;;  %3009 = vpow2.f32 %v1015_v45  ;;  %v1017_v34 = vmul.f32 1.442695, %v926_v50  ;;  %v3702_v35 = vadd.f32 %v3357_v48, %v3596_v61  ;;  %2797 = vmatprep.subr.bf16.mxu0 %v2947_v21 }
 0x143   : > { %v1039_v5 = vmul.f32 1.442695, %v4379_v17  ;;  %v3704_v54 = vmul.f32 1.050701, %v1301_v62  ;;  %v3706_v41 = vmul.f32 1.050701, %v1299_v49  ;;  %v1315_v9 = vsel %vm1251_vm1, %v3415_v36, %v1187_v38  ;;  %v3006_v39 = vpop.eup %3005 }
 0x144   : > { %v2451_v40 = vadd.f32 -1.0, %v2998_v58  ;;  %vm1241_vm7 = vcmp.gt.f32.partialorder %v3545_v18, 0.0  ;;  %v2449_v61 = vadd.f32 -1.0, %v3002_v10  ;;  %vm1239_vm8 = vcmp.gt.f32.partialorder %v3565_v57, 0.0 }
 0x145   : > { %v2464_v29 = vadd.f32 -1.0, %v3000_v1  ;;  %vm1252_vm9 = vcmp.gt.f32.partialorder %v3445_v51, 0.0  ;;  %3011 = vpow2.f32 %v1011_v56  ;;  %v924_v30 = vmin.f32 %v3702_v35, 0.0  ;;  %v3008_v38 = vpop.eup %3007  ;;  %2798 = vmatpush3.bf16.msra.mxu0 %v2947_v21 }
 0x146   : > { %v3718_v52 = vmul.f32 1.050701, %v1302_v43  ;;  %v2452_v45 = vadd.f32 -1.0, %v3004_v0  ;;  %vm1242_vm10 = vcmp.gt.f32.partialorder %v3568_v2, 0.0  ;;  %3013 = vpow2.f32 %v1039_v5  ;;  %2799 = vmatprep.subr.bf16.mxu0 %v2948_v55  ;;  %v2949_v43 = vld [vmem:[%s4364_s5 + $0x20] sm:$0xff]  }
 0x147   : > { %v4380_v36 = vmin.f32 %v3535_v22, 0.0  ;;  %v1172_v62 = vmul.f32 1.6732632, %v2446_v28  ;;  %3015 = vpow2.f32 %v1017_v34  ;;  %v1013_v49 = vmul.f32 1.442695, %v924_v30 }
 0x148   : > { %v1417_v1 = vpack.c.bf16 %v1360_v16, %v3662_v24  ;;  %v3724_v50 = vmul.f32 1.050701, %v1315_v9  ;;  %v2462_v56 = vadd.f32 -1.0, %v3006_v39  ;;  %v938_v10 = vmin.f32 %v3581_v8, 0.0 }
 0x149   : > { %v1035_v58 = vmul.f32 1.442695, %v4380_v36  ;;  %v1177_v17 = vmul.f32 1.6732632, %v2451_v40  ;;  %v1175_v5 = vmul.f32 1.6732632, %v2449_v61  ;;  %v1418_v16 = vpack.c.bf16 %v3676_v47, %v3643_v60  ;;  %2800 = vmatpush3.bf16.msra.mxu0 %v2948_v55 }
 0x14a   : > { %v1190_v0 = vmul.f32 1.6732632, %v2464_v29  ;;  %2741 = vmatprep.mubr.bf16.mxu1 %v1417_v1  ;;  %v1178_v28 = vmul.f32 1.6732632, %v2452_v45  ;;  %v2450_v34 = vadd.f32 -1.0, %v3008_v38  ;;  %vm1240_vm11 = vcmp.gt.f32.partialorder %v3588_v46, 0.0  ;;  %2801 = vmatprep.subr.bf16.mxu0 %v2949_v43 }
 0x14b   : > { %3017 = vpow2.f32 %v1035_v58  ;;  %v1041_v24 = vmul.f32 1.442695, %v938_v10  ;;  %v936_v21 = vmin.f32 %v3681_v12, 0.0  ;;  %v3736_v9 = vadd.f32 %v3616_v19, %v3357_v48  ;;  %v2950_v19 = vld [vmem:[%s4364_s5 + $0x28] sm:$0xff]   ;;  %2742 = vmatmul.mubr.bf16.gmra.mrb[44].mxu1 %v1418_v16 }
 0x14c   : > { %3019 = vpow2.f32 %v1013_v49  ;;  %v3740_v40 = vadd.f32 %v3357_v48, %v3621_v31  ;;  %v3744_v39 = vadd.f32 %v3624_v44, %v3357_v48  ;;  %v1300_v61 = vsel %vm1236_vm5, %v3540_v26, %v1172_v62  ;;  %v3010_v47 = vpop.eup %3009 }
 0x14d   : > { %v1188_v29 = vmul.f32 1.6732632, %v2462_v56  ;;  %3021 = vpow2.f32 %v1041_v24  ;;  %v1037_v60 = vmul.f32 1.442695, %v936_v21  ;;  %v1305_v31 = vsel %vm1241_vm7, %v3545_v18, %v1177_v17  ;;  %2802 = vmatpush3.bf16.msra.mxu0 %v2949_v43 }
 0x14e   : > { %v929_v44 = vmin.f32 %v3736_v9, 0.0  ;;  %v927_v55 = vmin.f32 %v3740_v40, 0.0  ;;  %v3759_v26 = vadd.f32 %v3406_v27, %v3357_v48  ;;  %v1303_v30 = vsel %vm1239_vm8, %v3565_v57, %v1175_v5  ;;  %2803 = vmatprep.subr.bf16.mxu0 %v2950_v19 }
 0x14f   : > { %v1318_v45 = vsel %vm1254_vm6, %v3440_v63, %v1190_v0  ;;  %3023 = vpow2.f32 %v1037_v60  ;;  %v930_v18 = vmin.f32 %v3744_v39, 0.0  ;;  %v3012_v36 = vpop.eup %3011  ;;  %v1306_v58 = vsel %vm1242_vm10, %v3568_v2, %v1178_v28 }
 0x150   : > { %v1176_v38 = vmul.f32 1.6732632, %v2450_v34  ;;  %vm1245_vm12 = vcmp.gt.f32.partialorder %v3639_v25, 0.0  ;;  %v1023_v27 = vmul.f32 1.442695, %v929_v44  ;;  %v3014_v49 = vpop.eup %3013  ;;  %v1316_v63 = vsel %vm1252_vm9, %v3445_v51, %v1188_v29 }
 0x151   : > { %v1019_v62 = vmul.f32 1.442695, %v927_v55  ;;  %v3772_v57 = vmul.f32 1.050701, %v1300_v61  ;;  %v2455_v1 = vadd.f32 -1.0, %v3010_v47  ;;  %vm1257_vm13 = vcmp.gt.f32.partialorder %v3531_v7, 0.0  ;;  %v3016_v10 = vpop.eup %3015  ;;  %2804 = vmatpush3.bf16.msra.mxu0 %v2950_v19 }
 0x152   : > { %v1025_v56 = vmul.f32 1.442695, %v930_v18  ;;  %v3778_v2 = vmul.f32 1.050701, %v1305_v31  ;;  %v3780_v17 = vmul.f32 1.050701, %v1318_v45  ;;  %3025 = vpow2.f32 %v1023_v27 }
 0x153   : > { %vm1243_vm14 = vcmp.gt.f32.partialorder %v3651_v20, 0.0  ;;  %v941_v43 = vmin.f32 %v3759_v26, 0.0  ;;  %v3784_v0 = vmul.f32 1.050701, %v1303_v30  ;;  %v3786_v28 = vmul.f32 1.050701, %v1306_v58 }
 0x154   : > { %v2453_v51 = vadd.f32 -1.0, %v3012_v36  ;;  %v1304_v24 = vsel %vm1240_vm11, %v3588_v46, %v1176_v38  ;;  %v3791_v21 = vmul.f32 1.050701, %v1316_v63  ;;  %v2467_v16 = vadd.f32 -1.0, %v3014_v49 }
 0x155   : > { %v3018_v5 = vpop.eup %3017  ;;  %vm1255_vm15 = vcmp.gt.f32.partialorder %v3535_v22, 0.0  ;;  %3027 = vpow2.f32 %v1019_v62  ;;  %v1181_v61 = vmul.f32 1.6732632, %v2455_v1  ;;  %v2456_v29 = vadd.f32 -1.0, %v3016_v10 }
 0x156   : > { %v3020_v34 = vpop.eup %3019  ;;  %vm1246_vm0 = vcmp.gt.f32.partialorder %v3674_v11, 0.0  ;;  %3029 = vpow2.f32 %v1025_v56  ;;  %v1047_v60 = vmul.f32 1.442695, %v941_v43  ;;  %vm1244_vm1 = vcmp.gt.f32.partialorder %v3702_v35, 0.0 }
 0x157   : > { %v2454_v47 = vadd.f32 -1.0, %v3020_v34  ;;  %v2465_v31 = vadd.f32 -1.0, %v3018_v5  ;;  %v3798_v46 = vadd.f32 %v3357_v48, %v3632_v6  ;;  %v3802_v44 = vadd.f32 %v3357_v48, %v3412_v32  ;;  %v3022_v55 = vpop.eup %3021 }
 0x158   : > { %v1179_v19 = vmul.f32 1.6732632, %v2453_v51  ;;  %3031 = vpow2.f32 %v1047_v60  ;;  %v3806_v30 = vadd.f32 %v3417_v37, %v3357_v48  ;;  %v3810_v45 = vadd.f32 %v3357_v48, %v3426_v42 }
 0x159   : > { %v1193_v18 = vmul.f32 1.6732632, %v2467_v16  ;;  %v2468_v36 = vadd.f32 -1.0, %v3022_v55  ;;  %vm1258_vm2 = vcmp.gt.f32.partialorder %v3581_v8, 0.0  ;;  %v928_v6 = vmin.f32 %v3798_v46, 0.0  ;;  %v3024_v58 = vpop.eup %3023 }
 0x15a   : > { %v3814_v32 = vmul.f32 1.050701, %v1304_v24  ;;  %v1309_v38 = vsel %vm1245_vm12, %v3639_v25, %v1181_v61  ;;  %v1182_v27 = vmul.f32 1.6732632, %v2456_v29  ;;  %v939_v37 = vmin.f32 %v3802_v44, 0.0 }
 0x15b   : > { %v1180_v62 = vmul.f32 1.6732632, %v2454_v47  ;;  %v1191_v49 = vmul.f32 1.6732632, %v2465_v31  ;;  %v2466_v42 = vadd.f32 -1.0, %v3024_v58  ;;  %v942_v63 = vmin.f32 %v3806_v30, 0.0 }
 0x15c   : > { %v1307_v1 = vsel %vm1243_vm14, %v3651_v20, %v1179_v19  ;;  %v1021_v56 = vmul.f32 1.442695, %v928_v6  ;;  %v1043_v10 = vmul.f32 1.442695, %v939_v37  ;;  %v940_v43 = vmin.f32 %v3810_v45, 0.0  ;;  %v3026_v34 = vpop.eup %3025 }
 0x15d   : > { %v1321_v25 = vsel %vm1257_vm13, %v3531_v7, %v1193_v18  ;;  %v1194_v5 = vmul.f32 1.6732632, %v2468_v36  ;;  %vm1256_vm3 = vcmp.gt.f32.partialorder %v3681_v12, 0.0  ;;  %v1049_v51 = vmul.f32 1.442695, %v942_v63 }
 0x15e   : > { %v3829_v24 = vmul.f32 1.050701, %v1309_v38  ;;  %v1192_v16 = vmul.f32 1.6732632, %v2466_v42  ;;  %3033 = vpow2.f32 %v1021_v56  ;;  %v1045_v61 = vmul.f32 1.442695, %v940_v43 }
 0x15f   : > { %v3028_v29 = vpop.eup %3027  ;;  %v3831_v20 = vmul.f32 1.050701, %v1307_v1  ;;  %v1310_v60 = vsel %vm1246_vm0, %v3674_v11, %v1182_v27  ;;  %3035 = vpow2.f32 %v1043_v10  ;;  %v1419_v7 = vpack.c.bf16 %v3772_v57, %v3706_v41  ;;  %v3885_v37 = vld [vmem:[%s4361_s2] ss:$0 sm:$0xff] }
 0x160   : > { %v3030_v47 = vpop.eup %3029  ;;  %v3838_v31 = vmul.f32 1.050701, %v1321_v25  ;;  %v1308_v55 = vsel %vm1244_vm1, %v3702_v35, %v1180_v62  ;;  %v1319_v19 = vsel %vm1255_vm15, %v3535_v22, %v1191_v49  ;;  %3037 = vpow2.f32 %v1049_v51 }
 0x161   : > { %v1322_v11 = vsel %vm1258_vm2, %v3581_v8, %v1194_v5  ;;  %v2459_v18 = vadd.f32 -1.0, %v3026_v34  ;;  %vm1249_vm4 = vcmp.gt.f32.partialorder %v3736_v9, 0.0  ;;  %2745 = vmatprep.mubr.bf16.mxu1 %v1419_v7  ;;  %v1420_v41 = vpack.c.bf16 %v3718_v52, %v3704_v54 }
 0x162   : > { %v3854_v57 = vadd.f32 %v3447_v4, %v3357_v48  ;;  %v3032_v35 = vpop.eup %3031  ;;  %v1320_v22 = vsel %vm1256_vm3, %v3681_v12, %v1192_v16  ;;  %vm1247_vm5 = vcmp.gt.f32.partialorder %v3740_v40, 0.0  ;;  %vm1261_vm6 = vcmp.gt.f32.partialorder %v3759_v26, 0.0 }
 0x163   : > { %3039 = vpow2.f32 %v1045_v61  ;;  %v3863_v8 = vadd.f32 %v3357_v48, %v3459_v15  ;;  %v3867_v54 = vadd.f32 %v3466_v23, %v3357_v48  ;;  %v3869_v4 = vmul.f32 1.050701, %v1310_v60  ;;  %2746 = vmatmul.mubr.bf16.gmra.mrb[48].mxu1 %v1420_v41 }
 0x164   : > { %v2457_v52 = vadd.f32 -1.0, %v3028_v29  ;;  %v2460_v36 = vadd.f32 -1.0, %v3030_v47  ;;  %vm1250_vm7 = vcmp.gt.f32.partialorder %v3744_v39, 0.0  ;;  %v945_v12 = vmin.f32 %v3854_v57, 0.0 }
 0x165   : > { %v3873_v6 = vmul.f32 1.050701, %v1308_v55  ;;  %v3875_v58 = vmul.f32 1.050701, %v1319_v19  ;;  %v2471_v38 = vadd.f32 -1.0, %v3032_v35  ;;  %v943_v15 = vmin.f32 %v3863_v8, 0.0 }
 0x166   : > { %v3878_v27 = vmul.f32 1.050701, %v1322_v11  ;;  %v3880_v48 = vmul.f32 1.050701, %v1320_v22  ;;  %v1055_v23 = vmul.f32 1.442695, %v945_v12  ;;  %v3889_v62 = vadd.f32 %v3885_v37, %v3475_v33 }
 0x167   : > { %v1185_v49 = vmul.f32 1.6732632, %v2459_v18  ;;  %vm1259_vm8 = vcmp.gt.f32.partialorder %v3802_v44, 0.0  ;;  %v1051_v42 = vmul.f32 1.442695, %v943_v15  ;;  %v946_v63 = vmin.f32 %v3867_v54, 0.0 }
 0x168   : > { %v1183_v1 = vmul.f32 1.6732632, %v2457_v52  ;;  %v1186_v56 = vmul.f32 1.6732632, %v2460_v36  ;;  %vm1248_vm9 = vcmp.gt.f32.partialorder %v3798_v46, 0.0  ;;  %3041 = vpow2.f32 %v1055_v23  ;;  %v3034_v43 = vpop.eup %3033  ;;  %v4381_v55 = vld [vmem:[#allocation2_spill] sm:$0xff] }
 0x169   : > { %v944_v10 = vmin.f32 %v3889_v62, 0.0  ;;  %v1197_v25 = vmul.f32 1.6732632, %v2471_v38  ;;  %3043 = vpow2.f32 %v1051_v42  ;;  %v1057_v5 = vmul.f32 1.442695, %v946_v63  ;;  %v3036_v51 = vpop.eup %3035 }
 0x16a   : > { %v1421_v33 = vpack.c.bf16 %v3814_v32, %v3784_v0  ;;  %v2458_v34 = vadd.f32 -1.0, %v3034_v43  ;;  %v1422_v61 = vpack.c.bf16 %v3786_v28, %v3778_v2  ;;  %v3901_v29 = vadd.f32 %v3885_v37, %v3485_v59  ;;  %v3038_v60 = vpop.eup %3037  ;;  %v4382_v28 = vld [vmem:[#allocation3_spill] sm:$0xff] }
 0x16b   : > { %v1053_v16 = vmul.f32 1.442695, %v944_v10  ;;  %v1313_v7 = vsel %vm1249_vm4, %v3736_v9, %v1185_v49  ;;  %v2469_v47 = vadd.f32 -1.0, %v3036_v51  ;;  %3045 = vpow2.f32 %v1057_v5 }
 0x16c   : > { %2749 = vmatprep.mubr.bf16.mxu1 %v1421_v33  ;;  %v3908_v0 = vadd.f32 %v3885_v37, %v4381_v55  ;;  %v1311_v2 = vsel %vm1247_vm5, %v3740_v40, %v1183_v1  ;;  %v949_v59 = vmin.f32 %v3901_v29, 0.0  ;;  %v3916_v32 = vadd.f32 %v3885_v37, %v4382_v28  ;;  %v4384_v33 = vld [vmem:[#allocation5_spill] sm:$0xff] }
 0x16d   : > { %3047 = vpow2.f32 %v1053_v16  ;;  %2750 = vmatmul.mubr.bf16.gmra.mrb[52].mxu1 %v1422_v61  ;;  %v3040_v9 = vpop.eup %3039  ;;  %v1314_v19 = vsel %vm1250_vm7, %v3744_v39, %v1186_v56  ;;  %v1184_v11 = vmul.f32 1.6732632, %v2458_v34  ;;  %v2472_v18 = vadd.f32 -1.0, %v3038_v60  ;;  %v4383_v56 = vld [vmem:[#allocation4_spill] sm:$0xff]  ;;  %v4385_v34 = vld [vmem:[#allocation6_spill] sm:$0xff] }
 0x16e   : > { %vm1262_vm10 = vcmp.gt.f32.partialorder %v3806_v30, 0.0  ;;  %v947_v41 = vmin.f32 %v3908_v0, 0.0  ;;  %v3923_v40 = vmul.f32 1.050701, %v1313_v7  ;;  %v1325_v35 = vsel %vm1261_vm6, %v3759_v26, %v1197_v25 }
 0x16f   : > { %v1195_v22 = vmul.f32 1.6732632, %v2469_v47  ;;  %v1063_v52 = vmul.f32 1.442695, %v949_v59  ;;  %v3928_v36 = vmul.f32 1.050701, %v1311_v2  ;;  %v1312_v26 = vsel %vm1248_vm9, %v3798_v46, %v1184_v11 }
 0x170   : > { %vm1260_vm11 = vcmp.gt.f32.partialorder %v3810_v45, 0.0  ;;  %vm1265_vm12 = vcmp.gt.f32.partialorder %v3854_v57, 0.0  ;;  %v1059_v39 = vmul.f32 1.442695, %v947_v41  ;;  %v3932_v12 = vmul.f32 1.050701, %v1314_v19 }
 0x171   : > { %v2470_v38 = vadd.f32 -1.0, %v3040_v9  ;;  %3049 = vpow2.f32 %v1063_v52  ;;  %v950_v15 = vmin.f32 %v3916_v32, 0.0  ;;  %v3935_v23 = vmul.f32 1.050701, %v1325_v35  ;;  %v4386_v52 = vld [vmem:[#allocation7_spill] sm:$0xff] }
 0x172   : > { %v1198_v49 = vmul.f32 1.6732632, %v2472_v18  ;;  %vm1263_vm13 = vcmp.gt.f32.partialorder %v3863_v8, 0.0  ;;  %3051 = vpow2.f32 %v1059_v39  ;;  %v3042_v42 = vpop.eup %3041  ;;  %v1323_v63 = vsel %vm1259_vm8, %v3802_v44, %v1195_v22 }
 0x173   : > { %v1065_v1 = vmul.f32 1.442695, %v950_v15  ;;  %v3946_v10 = vadd.f32 %v3885_v37, %v4383_v56  ;;  %v1423_v43 = vpack.c.bf16 %v3873_v6, %v3831_v20  ;;  %v3044_v25 = vpop.eup %3043  ;;  %v2475_v5 = vadd.f32 -1.0, %v3042_v42 }
 0x174   : > { %v1424_v46 = vpack.c.bf16 %v3869_v4, %v3829_v24  ;;  %v3954_v51 = vadd.f32 %v3885_v37, %v4384_v33  ;;  %v3958_v44 = vadd.f32 %v3885_v37, %v4385_v34  ;;  %v1196_v16 = vmul.f32 1.6732632, %v2470_v38 }
 0x175   : > { %v2473_v61 = vadd.f32 -1.0, %v3044_v25  ;;  %3053 = vpow2.f32 %v1065_v1  ;;  %v948_v60 = vmin.f32 %v3946_v10, 0.0  ;;  %2753 = vmatprep.mubr.bf16.mxu1 %v1423_v43  ;;  %v3046_v20 = vpop.eup %3045  ;;  %v1376_v6 = vmul.f32 1.050701, %v1312_v26 }
 0x176   : > { %v1201_v7 = vmul.f32 1.6732632, %v2475_v5  ;;  %2754 = vmatmul.mubr.bf16.gmra.mrb[56].mxu1 %v1424_v46  ;;  %v953_v24 = vmin.f32 %v3954_v51, 0.0  ;;  %v951_v4 = vmin.f32 %v3958_v44, 0.0  ;;  %v3963_v55 = vmul.f32 1.050701, %v1323_v63 }
 0x177   : > { %v3048_v47 = vpop.eup %3047  ;;  %v2476_v2 = vadd.f32 -1.0, %v3046_v20  ;;  %vm1266_vm14 = vcmp.gt.f32.partialorder %v3867_v54, 0.0  ;;  %v1061_v59 = vmul.f32 1.442695, %v948_v60  ;;  %vm1264_vm15 = vcmp.gt.f32.partialorder %v3889_v62, 0.0  ;;  %v4388_v60 = vld [vmem:[#allocation9_spill] sm:$0xff] }
 0x178   : > { %v2474_v28 = vadd.f32 -1.0, %v3048_v47  ;;  %v1071_v9 = vmul.f32 1.442695, %v953_v24  ;;  %v1067_v19 = vmul.f32 1.442695, %v951_v4  ;;  %v1326_v11 = vsel %vm1262_vm10, %v3806_v30, %v1198_v49 }
 0x179   : > { %v1324_v18 = vsel %vm1260_vm11, %v3810_v45, %v1196_v16  ;;  %v1199_v41 = vmul.f32 1.6732632, %v2473_v61  ;;  %3055 = vpow2.f32 %v1061_v59  ;;  %v1329_v35 = vsel %vm1265_vm12, %v3854_v57, %v1201_v7  ;;  %v4387_v45 = vld [vmem:[#allocation8_spill] sm:$0xff] }
 0x17a   : > { %v1202_v22 = vmul.f32 1.6732632, %v2476_v2  ;;  %vm1269_vm0 = vcmp.gt.f32.partialorder %v3901_v29, 0.0  ;;  %3057 = vpow2.f32 %v1071_v9  ;;  %v3979_v39 = vadd.f32 %v3885_v37, %v4386_v52  ;;  %v4390_v9 = vld [vmem:[#allocation11_spill] sm:$0xff] }
 0x17b   : > { %v3050_v38 = vpop.eup %3049  ;;  %v1200_v30 = vmul.f32 1.6732632, %v2474_v28  ;;  %vm1267_vm1 = vcmp.gt.f32.partialorder %v3908_v0, 0.0  ;;  %3059 = vpow2.f32 %v1067_v19  ;;  %v3984_v15 = vadd.f32 %v3885_v37, %v4387_v45 }
 0x17c   : > { %v1425_v26 = vpack.c.bf16 %v1376_v6, %v3928_v36  ;;  %v3052_v57 = vpop.eup %3051  ;;  %v3987_v49 = vmul.f32 1.050701, %v1326_v11  ;;  %v3989_v42 = vmul.f32 1.050701, %v1324_v18  ;;  %vm1270_vm2 = vcmp.gt.f32.partialorder %v3916_v32, 0.0  ;;  %v4391_v11 = vld [vmem:[#allocation12_spill] sm:$0xff] }
 0x17d   : > { %v954_v63 = vmin.f32 %v3979_v39, 0.0  ;;  %v3993_v1 = vmul.f32 1.050701, %v1329_v35  ;;  %v1327_v56 = vsel %vm1263_vm13, %v3863_v8, %v1199_v41  ;;  %v2479_v43 = vadd.f32 -1.0, %v3050_v38 }
 0x17e   : > { %v952_v25 = vmin.f32 %v3984_v15, 0.0  ;;  %2757 = vmatprep.mubr.bf16.mxu1 %v1425_v26  ;;  %v1330_v36 = vsel %vm1266_vm14, %v3867_v54, %v1202_v22  ;;  %v2477_v5 = vadd.f32 -1.0, %v3052_v57  ;;  %v1426_v33 = vpack.c.bf16 %v3932_v12, %v3923_v40  ;;  %v4389_v12 = vld [vmem:[#allocation10_spill] sm:$0xff] }
 0x17f   : > { %v1073_v46 = vmul.f32 1.442695, %v954_v63  ;;  %v3054_v34 = vpop.eup %3053  ;;  %v1328_v16 = vsel %vm1264_vm15, %v3889_v62, %v1200_v30  ;;  %vm1268_vm3 = vcmp.gt.f32.partialorder %v3946_v10, 0.0  ;;  %vm1273_vm4 = vcmp.gt.f32.partialorder %v3954_v51, 0.0 }
 0x180   : > { %v1069_v8 = vmul.f32 1.442695, %v952_v25  ;;  %v1427_v61 = vpack.c.bf16 %v3791_v21, %v3724_v50  ;;  %v4013_v54 = vadd.f32 %v3885_v37, %v4388_v60  ;;  %v4015_v20 = vmul.f32 1.050701, %v1327_v56  ;;  %2758 = vmatmul.mubr.bf16.gmra.mrb[60].mxu1 %v1426_v33  ;;  %v2951_v21 = vld [vmem:[%s4364_s5 + $0x30] sm:$0xff]  }
 0x181   : > { %v2480_v40 = vadd.f32 -1.0, %v3054_v34  ;;  %3061 = vpow2.f32 %v1073_v46  ;;  %v4019_v62 = vadd.f32 %v3885_v37, %v4389_v12  ;;  %v4021_v6 = vmul.f32 1.050701, %v1330_v36  ;;  %2805 = vmatprep.subr.bf16.mxu0 %v2951_v21 }
 0x182   : > { %v1205_v7 = vmul.f32 1.6732632, %v2479_v43  ;;  %3063 = vpow2.f32 %v1069_v8  ;;  %2761 = vmatprep.mubr.bf16.mxu1 %v1427_v61  ;;  %v957_v50 = vmin.f32 %v4013_v54, 0.0  ;;  %v4027_v24 = vmul.f32 1.050701, %v1328_v16  ;;  %2806 = vmatpush3.bf16.msra.mxu0 %v2951_v21 }
 0x183   : > { %v1203_v4 = vmul.f32 1.6732632, %v2477_v5  ;;  %vm1271_vm5 = vcmp.gt.f32.partialorder %v3958_v44, 0.0  ;;  %v955_v47 = vmin.f32 %v4019_v62, 0.0  ;;  %v3056_v2 = vpop.eup %3055  ;;  %v1206_v59 = vmul.f32 1.6732632, %v2480_v40 }
 0x184   : > { %v1079_v28 = vmul.f32 1.442695, %v957_v50  ;;  %v4033_v19 = vadd.f32 %v3885_v37, %v4390_v9  ;;  %v4037_v18 = vadd.f32 %v3885_v37, %v4391_v11  ;;  %v3058_v41 = vpop.eup %3057  ;;  %v2478_v35 = vadd.f32 -1.0, %v3056_v2 }
 0x185   : > { %vm1274_vm6 = vcmp.gt.f32.partialorder %v3979_v39, 0.0  ;;  %v1075_v22 = vmul.f32 1.442695, %v955_v47  ;;  %v1428_v52 = vpack.c.bf16 %v3780_v17, %v3694_v3  ;;  %v3060_v38 = vpop.eup %3059  ;;  %v1333_v30 = vsel %vm1269_vm0, %v3901_v29, %v1205_v7  ;;  %v4392_v7 = vld [vmem:[#allocation13_spill] sm:$0xff] }
 0x186   : > { %v2483_v45 = vadd.f32 -1.0, %v3058_v41  ;;  %vm1272_vm7 = vcmp.gt.f32.partialorder %v3984_v15, 0.0  ;;  %3065 = vpow2.f32 %v1079_v28  ;;  %v958_v26 = vmin.f32 %v4033_v19, 0.0 }
 0x187   : > { %v1331_v57 = vsel %vm1267_vm1, %v3908_v0, %v1203_v4  ;;  %v1204_v63 = vmul.f32 1.6732632, %v2478_v35  ;;  %v2481_v56 = vadd.f32 -1.0, %v3060_v38  ;;  %3067 = vpow2.f32 %v1075_v22 }
 0x188   : > { %v1334_v3 = vsel %vm1270_vm2, %v3916_v32, %v1206_v59  ;;  %v1209_v17 = vmul.f32 1.6732632, %v2483_v45  ;;  %v1081_v43 = vmul.f32 1.442695, %v958_v26  ;;  %v956_v29 = vmin.f32 %v4037_v18, 0.0  ;;  %2762 = vmatmul.mubr.bf16.gmra.mrb[64].mxu1 %v1428_v52 }
 0x189   : > { %v4054_v25 = vmul.f32 1.050701, %v1333_v30  ;;  %v1207_v36 = vmul.f32 1.6732632, %v2481_v56  ;;  %v1429_v5 = vpack.c.bf16 %v3880_v48, %v3875_v58  ;;  %v4060_v0 = vadd.f32 %v3885_v37, %v3626_v14  ;;  %v2952_v48 = vld [vmem:[%s4364_s5 + $0x38] sm:$0xff]  }
 0x18a   : > { %v4062_v46 = vmul.f32 1.050701, %v1331_v57  ;;  %vm1277_vm8 = vcmp.gt.f32.partialorder %v4013_v54, 0.0  ;;  %3069 = vpow2.f32 %v1081_v43  ;;  %v1077_v32 = vmul.f32 1.442695, %v956_v29  ;;  %2807 = vmatprep.subr.bf16.mxu0 %v2952_v48 }
 0x18b   : > { %v3062_v33 = vpop.eup %3061  ;;  %v4065_v34 = vmul.f32 1.050701, %v1334_v3  ;;  %v1332_v16 = vsel %vm1268_vm3, %v3946_v10, %v1204_v63  ;;  %v1337_v58 = vsel %vm1273_vm4, %v3954_v51, %v1209_v17  ;;  %2765 = vmatprep.mubr.bf16.mxu1 %v1429_v5  ;;  %v961_v14 = vmin.f32 %v4060_v0, 0.0  ;;  %2808 = vmatpush3.bf16.msra.mxu0 %v2952_v48 }
 0x18c   : > { %v3064_v8 = vpop.eup %3063  ;;  %v1335_v61 = vsel %vm1271_vm5, %v3958_v44, %v1207_v36  ;;  %v2484_v60 = vadd.f32 -1.0, %v3062_v33  ;;  %vm1275_vm9 = vcmp.gt.f32.partialorder %v4019_v62, 0.0  ;;  %3071 = vpow2.f32 %v1077_v32 }
 0x18d   : > { %v4083_v10 = vadd.f32 %v3885_v37, %v3634_v13  ;;  %v2482_v51 = vadd.f32 -1.0, %v3064_v8  ;;  %v1087_v40 = vmul.f32 1.442695, %v961_v14  ;;  %v4087_v12 = vadd.f32 %v3885_v37, %v3641_v53 }
 0x18e   : > { %v4091_v50 = vadd.f32 %v3885_v37, %v4392_v7  ;;  %v4093_v44 = vmul.f32 1.050701, %v1332_v16  ;;  %v1210_v21 = vmul.f32 1.6732632, %v2484_v60  ;;  %v1430_v13 = vpack.c.bf16 %v3878_v27, %v3838_v31 }
 0x18f   : > { %v959_v4 = vmin.f32 %v4083_v10, 0.0  ;;  %v4098_v47 = vmul.f32 1.050701, %v1337_v58  ;;  %v1208_v2 = vmul.f32 1.6732632, %v2482_v51  ;;  %3073 = vpow2.f32 %v1087_v40 }
 0x190   : > { %v962_v53 = vmin.f32 %v4087_v12, 0.0  ;;  %v3066_v59 = vpop.eup %3065  ;;  %v4101_v28 = vmul.f32 1.050701, %v1335_v61  ;;  %v1338_v37 = vsel %vm1274_vm6, %v3979_v39, %v1210_v21  ;;  %v960_v11 = vmin.f32 %v4091_v50, 0.0  ;;  %2766 = vmatmul.mubr.bf16.gmra.mrb[68].mxu1 %v1430_v13 }
 0x191   : > { %v1083_v9 = vmul.f32 1.442695, %v959_v4  ;;  %v3068_v41 = vpop.eup %3067  ;;  %v4107_v35 = vmul.f32 1.050701, %v1338_v37  ;;  %v1336_v31 = vsel %vm1272_vm7, %v3984_v15, %v1208_v2  ;;  %v2487_v27 = vadd.f32 -1.0, %v3066_v59 }
 0x192   : > { %v1089_v22 = vmul.f32 1.442695, %v962_v53  ;;  %v4112_v52 = vmul.f32 1.050701, %v1336_v31  ;;  %v2485_v38 = vadd.f32 -1.0, %v3068_v41  ;;  %v1431_v39 = vpack.c.bf16 %v3989_v42, %v3963_v55 }
 0x193   : > { %3075 = vpow2.f32 %v1083_v9  ;;  %v1085_v30 = vmul.f32 1.442695, %v960_v11  ;;  %v1213_v45 = vmul.f32 1.6732632, %v2487_v27  ;;  %v1432_v26 = vpack.c.bf16 %v3987_v49, %v3935_v23 }
 0x194   : > { %3077 = vpow2.f32 %v1089_v22  ;;  %v3070_v57 = vpop.eup %3069  ;;  %v1211_v63 = vmul.f32 1.6732632, %v2485_v38  ;;  %v1433_v15 = vpack.c.bf16 %v4027_v24, %v4015_v20  ;;  %v1434_v56 = vpack.c.bf16 %v4021_v6, %v3993_v1  ;;  %2769 = vmatprep.mubr.bf16.mxu1 %v1431_v39 }
 0x195   : > { %3079 = vpow2.f32 %v1085_v30  ;;  %v1341_v3 = vsel %vm1277_vm8, %v4013_v54, %v1213_v45  ;;  %v2488_v17 = vadd.f32 -1.0, %v3070_v57  ;;  %v1435_v55 = vpack.c.bf16 %v4093_v44, %v4062_v46 }
 0x196   : > { %v1436_v23 = vpack.c.bf16 %v4065_v34, %v4054_v25  ;;  %v3072_v49 = vpop.eup %3071  ;;  %vm1278_vm10 = vcmp.gt.f32.partialorder %v4033_v19, 0.0  ;;  %v1437_v42 = vpack.c.bf16 %v4112_v52, %v4101_v28  ;;  %v1438_v1 = vpack.c.bf16 %v4107_v35, %v4098_v47 }
 0x197   : > { %v1339_v54 = vsel %vm1275_vm9, %v4019_v62, %v1211_v63  ;;  %v1214_v20 = vmul.f32 1.6732632, %v2488_v17  ;;  %v2486_v6 = vadd.f32 -1.0, %v3072_v49  ;;  %v1405_v24 = vmul.f32 1.050701, %v1341_v3 }
 0x198   : > { %vm1276_vm11 = vcmp.gt.f32.partialorder %v4037_v18, 0.0  ;;  %2770 = vmatmul.mubr.bf16.gmra.mrb[72].mxu1 %v1432_v26  ;;  %v1403_v36 = vmul.f32 1.050701, %v1339_v54  ;;  %vm1281_vm12 = vcmp.gt.f32.partialorder %v4060_v0, 0.0  ;;  %vm1279_vm13 = vcmp.gt.f32.partialorder %v4083_v10, 0.0 }
 0x199   : > { %v3074_v43 = vpop.eup %3073  ;;  %v1342_v29 = vsel %vm1278_vm10, %v4033_v19, %v1214_v20  ;;  %v1212_v25 = vmul.f32 1.6732632, %v2486_v6  ;;  %2773 = vmatprep.mubr.bf16.mxu1 %v1433_v15  ;;  %vm1282_vm14 = vcmp.gt.f32.partialorder %v4087_v12, 0.0  ;;  %vm1280_vm15 = vcmp.gt.f32.partialorder %v4091_v50, 0.0 }
 0x19a   : > { %v1406_v5 = vmul.f32 1.050701, %v1342_v29  ;;  %v2491_v46 = vadd.f32 -1.0, %v3074_v43 }
 0x19b   : > { %v1340_v32 = vsel %vm1276_vm11, %v4037_v18, %v1212_v25 }
 0x19c   : > { %v1404_v62 = vmul.f32 1.050701, %v1340_v32  ;;  %v1217_v34 = vmul.f32 1.6732632, %v2491_v46  ;;  %v1440_v16 = vpack.c.bf16 %v1406_v5, %v1405_v24 }
 0x19d   : > { %v3076_v33 = vpop.eup %3075 }
 0x19e   : > { %v3078_v58 = vpop.eup %3077  ;;  %v2489_v14 = vadd.f32 -1.0, %v3076_v33  ;;  %v1345_v8 = vsel %vm1281_vm12, %v4060_v0, %v1217_v34  ;;  %v1439_v61 = vpack.c.bf16 %v1404_v62, %v1403_v36 }
 0x19f   : > { %v3080_v48 = vpop.eup %3079  ;;  %v2492_v19 = vadd.f32 -1.0, %v3078_v58  ;;  %v1409_v40 = vmul.f32 1.050701, %v1345_v8 }
 0x1a0   : > { %v1215_v60 = vmul.f32 1.6732632, %v2489_v14  ;;  %v2490_v51 = vadd.f32 -1.0, %v3080_v48  ;;  %2774 = vmatmul.mubr.bf16.gmra.mrb[76].mxu1 %v1434_v56 }
 0x1a1   : > { %v1218_v18 = vmul.f32 1.6732632, %v2492_v19  ;;  %2777 = vmatprep.mubr.bf16.mxu1 %v1435_v55 }
 0x1a2   : > { %v1343_v7 = vsel %vm1279_vm13, %v4083_v10, %v1215_v60  ;;  %v1216_v44 = vmul.f32 1.6732632, %v2490_v51  ;;  %v4151_v10 = vld [vmem:[%s4363_s4] ss:$0 sm:$0xff] }
 0x1a3   : > { %v1407_v21 = vmul.f32 1.050701, %v1343_v7  ;;  %v1346_v4 = vsel %vm1282_vm14, %v4087_v12, %v1218_v18 }
 0x1a4   : > { %v1410_v0 = vmul.f32 1.050701, %v1346_v4  ;;  %v1344_v13 = vsel %vm1280_vm15, %v4091_v50, %v1216_v44 }
 0x1a5   : > { %v1408_v47 = vmul.f32 1.050701, %v1344_v13 }
 0x1a6   : > { %v1442_v2 = vpack.c.bf16 %v1410_v0, %v1409_v40 }
 0x1a7   : > { %v1441_v53 = vpack.c.bf16 %v1408_v47, %v1407_v21 }
 0x1a8   : > { %2778 = vmatmul.mubr.bf16.gmra.mrb[80].mxu1 %v1436_v23 }
 0x1a9   : > { %2781 = vmatprep.mubr.bf16.mxu1 %v1437_v42 }
 0x1b0   : > { %2782 = vmatmul.mubr.bf16.gmra.mrb[84].mxu1 %v1438_v1 }
 0x1b1   : > { %2785 = vmatprep.mubr.bf16.mxu1 %v1439_v61 }
 0x1b8   : > { %2786 = vmatmul.mubr.bf16.gmra.mrb[88].mxu1 %v1440_v16 }
 0x1b9   : > { %2789 = vmatprep.mubr.bf16.mxu1 %v1441_v53 }
 0x1c0   : > { %2790 = vmatmul.mubr.bf16.gmra.mrb[92].mxu1 %v1442_v2 }
 0x1f6   : > { %v2731_v12 = vpop.f32.mrb[32].mxu1 }
 0x1f7   : > { %v1557_v59 = vadd.f32 %v2731_v12, %v4151_v10  ;;  %v1548_v28 = vpop.f32.mrb[33].mxu1 }
 0x1f8   : > { %v1549_v50 = vadd.f32 %v4151_v10, %v1548_v28  ;;  %v2732_v37 = vpop.f32.mrb[34].mxu1 }
 0x1f9   : > { %3081 = vtanh.f32 %v1557_v59  ;;  %v1560_v9 = vadd.f32 %v2732_v37, %v4151_v10  ;;  %v1551_v11 = vpop.f32.mrb[35].mxu1 }
 0x1fa   : > { %3083 = vtanh.f32 %v1549_v50  ;;  %v1552_v41 = vadd.f32 %v4151_v10, %v1551_v11 }
 0x1fb   : > { %3085 = vtanh.f32 %v1560_v9 }
 0x1fc   : > { %3087 = vtanh.f32 %v1552_v41 }
 0x1ff   : > { %v2735_v35 = vpop.f32.mrb[36].mxu1 }
 0x200   : > { %v1573_v31 = vadd.f32 %v2735_v35, %v4151_v10  ;;  %v1564_v27 = vpop.f32.mrb[37].mxu1 }
 0x201   : > { %v1565_v22 = vadd.f32 %v4151_v10, %v1564_v27  ;;  %v2736_v52 = vpop.f32.mrb[38].mxu1 }
 0x202   : > { %3089 = vtanh.f32 %v1573_v31  ;;  %v1576_v38 = vadd.f32 %v2736_v52, %v4151_v10  ;;  %v1567_v30 = vpop.f32.mrb[39].mxu1 }
 0x203   : > { %v3082_v45 = vpop.eup %3081  ;;  %3091 = vtanh.f32 %v1565_v22  ;;  %v1568_v39 = vadd.f32 %v4151_v10, %v1567_v30 }
 0x204   : > { %v3084_v26 = vpop.eup %3083  ;;  %3093 = vtanh.f32 %v1576_v38 }
 0x205   : > { %v3086_v57 = vpop.eup %3085  ;;  %3095 = vtanh.f32 %v1568_v39 }
 0x206   : > { %v3088_v63 = vpop.eup %3087  ;;  %v1868_v15 = vpack.c.bf16 %v3086_v57, %v3082_v45 }
 0x207   : > { %v1867_v56 = vpack.c.bf16 %v3088_v63, %v3084_v26 }
 0x209   : > { %2809 = vmatprep.mubr.bf16.mxu0 %v1867_v56 }
 0x20a   : > { %2810 = vmatmul.mubr.bf16.vlgmr.msra.gmra.mrb[32].mxu0 %v1868_v15 }
 0x20c   : > { %v3090_v3 = vpop.eup %3089 }
 0x20d   : > { %v3092_v17 = vpop.eup %3091 }
 0x20e   : > { %v3094_v55 = vpop.eup %3093  ;;  %v2739_v23 = vpop.f32.mrb[40].mxu1 }
 0x20f   : > { %v3096_v49 = vpop.eup %3095  ;;  %v1589_v42 = vadd.f32 %v2739_v23, %v4151_v10  ;;  %v1580_v1 = vpop.f32.mrb[41].mxu1  ;;  %v1870_v54 = vpack.c.bf16 %v3094_v55, %v3090_v3 }
 0x210   : > { %v1581_v20 = vadd.f32 %v4151_v10, %v1580_v1  ;;  %v2740_v6 = vpop.f32.mrb[42].mxu1  ;;  %v1869_v24 = vpack.c.bf16 %v3096_v49, %v3092_v17 }
 0x211   : > { %3097 = vtanh.f32 %v1589_v42  ;;  %v1592_v43 = vadd.f32 %v2740_v6, %v4151_v10  ;;  %v1583_v29 = vpop.f32.mrb[43].mxu1 }
 0x212   : > { %3099 = vtanh.f32 %v1581_v20  ;;  %v1584_v25 = vadd.f32 %v4151_v10, %v1583_v29  ;;  %2813 = vmatprep.mubr.bf16.mxu0 %v1869_v24 }
 0x213   : > { %3101 = vtanh.f32 %v1592_v43  ;;  %2814 = vmatmul.mubr.bf16.gmra.mrb[36].mxu0 %v1870_v54 }
 0x214   : > { %3103 = vtanh.f32 %v1584_v25 }
 0x21b   : > { %v3098_v36 = vpop.eup %3097 }
 0x21c   : > { %v3100_v5 = vpop.eup %3099 }
 0x21d   : > { %v3102_v46 = vpop.eup %3101 }
 0x21e   : > { %v3104_v32 = vpop.eup %3103  ;;  %v1872_v33 = vpack.c.bf16 %v3102_v46, %v3098_v36  ;;  %v2743_v62 = vpop.f32.mrb[44].mxu1 }
 0x21f   : > { %v1871_v34 = vpack.c.bf16 %v3104_v32, %v3100_v5  ;;  %v1605_v16 = vadd.f32 %v2743_v62, %v4151_v10  ;;  %v1596_v58 = vpop.f32.mrb[45].mxu1 }
 0x220   : > { %v1597_v14 = vadd.f32 %v4151_v10, %v1596_v58  ;;  %v2744_v48 = vpop.f32.mrb[46].mxu1 }
 0x221   : > { %2817 = vmatprep.mubr.bf16.mxu0 %v1871_v34  ;;  %3105 = vtanh.f32 %v1605_v16  ;;  %v1608_v8 = vadd.f32 %v2744_v48, %v4151_v10  ;;  %v1599_v19 = vpop.f32.mrb[47].mxu1 }
 0x222   : > { %2818 = vmatmul.mubr.bf16.gmra.mrb[40].mxu0 %v1872_v33  ;;  %3107 = vtanh.f32 %v1597_v14  ;;  %v1600_v61 = vadd.f32 %v4151_v10, %v1599_v19 }
 0x223   : > { %3109 = vtanh.f32 %v1608_v8 }
 0x224   : > { %3111 = vtanh.f32 %v1600_v61 }
 0x22b   : > { %v3106_v60 = vpop.eup %3105 }
 0x22c   : > { %v3108_v51 = vpop.eup %3107 }
 0x22d   : > { %v3110_v18 = vpop.eup %3109 }
 0x22e   : > { %v3112_v40 = vpop.eup %3111  ;;  %v1874_v7 = vpack.c.bf16 %v3110_v18, %v3106_v60 }
 0x22f   : > { %v1873_v44 = vpack.c.bf16 %v3112_v40, %v3108_v51 }
 0x231   : > { %2821 = vmatprep.mubr.bf16.mxu0 %v1873_v44 }
 0x232   : > { %2822 = vmatmul.mubr.bf16.gmra.mrb[44].mxu0 %v1874_v7 }
 0x236   : > { %v2747_v21 = vpop.f32.mrb[48].mxu1 }
 0x237   : > { %v1621_v4 = vadd.f32 %v2747_v21, %v4151_v10  ;;  %v1612_v0 = vpop.f32.mrb[49].mxu1 }
 0x238   : > { %v1613_v13 = vadd.f32 %v4151_v10, %v1612_v0  ;;  %v2748_v47 = vpop.f32.mrb[50].mxu1 }
 0x239   : > { %3113 = vtanh.f32 %v1621_v4  ;;  %v1624_v2 = vadd.f32 %v2748_v47, %v4151_v10  ;;  %v1615_v53 = vpop.f32.mrb[51].mxu1 }
 0x23a   : > { %3115 = vtanh.f32 %v1613_v13  ;;  %v1616_v12 = vadd.f32 %v4151_v10, %v1615_v53 }
 0x23b   : > { %3117 = vtanh.f32 %v1624_v2 }
 0x23c   : > { %3119 = vtanh.f32 %v1616_v12 }
 0x240   : > { %v2751_v59 = vpop.f32.mrb[52].mxu1 }
 0x241   : > { %v1637_v28 = vadd.f32 %v2751_v59, %v4151_v10  ;;  %v1628_v50 = vpop.f32.mrb[53].mxu1 }
 0x242   : > { %v1629_v37 = vadd.f32 %v4151_v10, %v1628_v50  ;;  %v2752_v9 = vpop.f32.mrb[54].mxu1 }
 0x243   : > { %3121 = vtanh.f32 %v1637_v28  ;;  %v1640_v11 = vadd.f32 %v2752_v9, %v4151_v10  ;;  %v1631_v41 = vpop.f32.mrb[55].mxu1  ;;  %v3114_v31 = vpop.eup %3113 }
 0x244   : > { %3123 = vtanh.f32 %v1629_v37  ;;  %v1632_v35 = vadd.f32 %v4151_v10, %v1631_v41  ;;  %v3116_v27 = vpop.eup %3115 }
 0x245   : > { %3125 = vtanh.f32 %v1640_v11  ;;  %v3118_v22 = vpop.eup %3117 }
 0x246   : > { %3127 = vtanh.f32 %v1632_v35  ;;  %v3120_v52 = vpop.eup %3119  ;;  %v1876_v38 = vpack.c.bf16 %v3118_v22, %v3114_v31 }
 0x247   : > { %v1875_v45 = vpack.c.bf16 %v3120_v52, %v3116_v27 }
 0x249   : > { %v2755_v30 = vpop.f32.mrb[56].mxu1  ;;  %2825 = vmatprep.mubr.bf16.mxu0 %v1875_v45 }
 0x24a   : > { %v1653_v39 = vadd.f32 %v2755_v30, %v4151_v10  ;;  %v1644_v26 = vpop.f32.mrb[57].mxu1  ;;  %2826 = vmatmul.mubr.bf16.gmra.mrb[48].mxu0 %v1876_v38 }
 0x24b   : > { %v1645_v57 = vadd.f32 %v4151_v10, %v1644_v26  ;;  %v2756_v63 = vpop.f32.mrb[58].mxu1 }
 0x24c   : > { %3129 = vtanh.f32 %v1653_v39  ;;  %v1656_v15 = vadd.f32 %v2756_v63, %v4151_v10  ;;  %v1647_v56 = vpop.f32.mrb[59].mxu1 }
 0x24d   : > { %v3122_v3 = vpop.eup %3121  ;;  %3131 = vtanh.f32 %v1645_v57  ;;  %v1648_v17 = vadd.f32 %v4151_v10, %v1647_v56 }
 0x24e   : > { %v3124_v55 = vpop.eup %3123  ;;  %3133 = vtanh.f32 %v1656_v15 }
 0x24f   : > { %v3126_v23 = vpop.eup %3125  ;;  %3135 = vtanh.f32 %v1648_v17 }
 0x250   : > { %v3128_v49 = vpop.eup %3127  ;;  %v1878_v42 = vpack.c.bf16 %v3126_v23, %v3122_v3 }
 0x251   : > { %v1877_v1 = vpack.c.bf16 %v3128_v49, %v3124_v55 }
 0x253   : > { %v2759_v54 = vpop.f32.mrb[60].mxu1  ;;  %2829 = vmatprep.mubr.bf16.mxu0 %v1877_v1 }
 0x254   : > { %v1669_v20 = vadd.f32 %v2759_v54, %v4151_v10  ;;  %v1660_v6 = vpop.f32.mrb[61].mxu1  ;;  %2830 = vmatmul.mubr.bf16.gmra.mrb[52].mxu0 %v1878_v42 }
 0x255   : > { %v1661_v24 = vadd.f32 %v4151_v10, %v1660_v6  ;;  %v2760_v43 = vpop.f32.mrb[62].mxu1 }
 0x256   : > { %v3130_v29 = vpop.eup %3129  ;;  %3137 = vtanh.f32 %v1669_v20  ;;  %v1672_v25 = vadd.f32 %v2760_v43, %v4151_v10  ;;  %v1663_v36 = vpop.f32.mrb[63].mxu1 }
 0x257   : > { %v3132_v5 = vpop.eup %3131  ;;  %3139 = vtanh.f32 %v1661_v24  ;;  %v1664_v46 = vadd.f32 %v4151_v10, %v1663_v36 }
 0x258   : > { %v3134_v32 = vpop.eup %3133  ;;  %3141 = vtanh.f32 %v1672_v25 }
 0x259   : > { %v3136_v33 = vpop.eup %3135  ;;  %3143 = vtanh.f32 %v1664_v46  ;;  %v1880_v62 = vpack.c.bf16 %v3134_v32, %v3130_v29 }
 0x25a   : > { %v1879_v34 = vpack.c.bf16 %v3136_v33, %v3132_v5 }
 0x25b   : > { %v2763_v16 = vpop.f32.mrb[64].mxu1 }
 0x25c   : > { %v1685_v58 = vadd.f32 %v2763_v16, %v4151_v10  ;;  %v1676_v14 = vpop.f32.mrb[65].mxu1  ;;  %2833 = vmatprep.mubr.bf16.mxu0 %v1879_v34 }
 0x25d   : > { %v1677_v48 = vadd.f32 %v4151_v10, %v1676_v14  ;;  %v2764_v8 = vpop.f32.mrb[66].mxu1  ;;  %2834 = vmatmul.mubr.bf16.gmra.mrb[56].mxu0 %v1880_v62 }
 0x25e   : > { %3145 = vtanh.f32 %v1685_v58  ;;  %v1688_v19 = vadd.f32 %v2764_v8, %v4151_v10  ;;  %v1679_v61 = vpop.f32.mrb[67].mxu1 }
 0x25f   : > { %3147 = vtanh.f32 %v1677_v48  ;;  %v1680_v60 = vadd.f32 %v4151_v10, %v1679_v61 }
 0x260   : > { %v3138_v51 = vpop.eup %3137  ;;  %3149 = vtanh.f32 %v1688_v19 }
 0x261   : > { %v3140_v18 = vpop.eup %3139  ;;  %3151 = vtanh.f32 %v1680_v60 }
 0x262   : > { %v3142_v40 = vpop.eup %3141 }
 0x263   : > { %v3144_v7 = vpop.eup %3143  ;;  %v2767_v44 = vpop.f32.mrb[68].mxu1  ;;  %v1882_v21 = vpack.c.bf16 %v3142_v40, %v3138_v51 }
 0x264   : > { %v1701_v4 = vadd.f32 %v2767_v44, %v4151_v10  ;;  %v1692_v0 = vpop.f32.mrb[69].mxu1  ;;  %v1881_v13 = vpack.c.bf16 %v3144_v7, %v3140_v18 }
 0x265   : > { %v1693_v47 = vadd.f32 %v4151_v10, %v1692_v0  ;;  %v2768_v2 = vpop.f32.mrb[70].mxu1 }
 0x266   : > { %3153 = vtanh.f32 %v1701_v4  ;;  %v1704_v53 = vadd.f32 %v2768_v2, %v4151_v10  ;;  %v1695_v12 = vpop.f32.mrb[71].mxu1  ;;  %2837 = vmatprep.mubr.bf16.mxu0 %v1881_v13 }
 0x267   : > { %3155 = vtanh.f32 %v1693_v47  ;;  %v1696_v59 = vadd.f32 %v4151_v10, %v1695_v12  ;;  %2838 = vmatmul.mubr.bf16.gmra.mrb[60].mxu0 %v1882_v21 }
 0x268   : > { %v3146_v28 = vpop.eup %3145  ;;  %3157 = vtanh.f32 %v1704_v53 }
 0x269   : > { %v3148_v50 = vpop.eup %3147  ;;  %3159 = vtanh.f32 %v1696_v59 }
 0x26a   : > { %v3150_v37 = vpop.eup %3149 }
 0x26b   : > { %v3152_v9 = vpop.eup %3151  ;;  %v2771_v11 = vpop.f32.mrb[72].mxu1  ;;  %v1884_v41 = vpack.c.bf16 %v3150_v37, %v3146_v28 }
 0x26c   : > { %v1717_v35 = vadd.f32 %v2771_v11, %v4151_v10  ;;  %v1708_v31 = vpop.f32.mrb[73].mxu1  ;;  %v1883_v27 = vpack.c.bf16 %v3152_v9, %v3148_v50 }
 0x26d   : > { %v1709_v22 = vadd.f32 %v4151_v10, %v1708_v31  ;;  %v2772_v52 = vpop.f32.mrb[74].mxu1 }
 0x26e   : > { %3161 = vtanh.f32 %v1717_v35  ;;  %v1720_v38 = vadd.f32 %v2772_v52, %v4151_v10  ;;  %v1711_v30 = vpop.f32.mrb[75].mxu1  ;;  %2841 = vmatprep.mubr.bf16.mxu0 %v1883_v27 }
 0x26f   : > { %3163 = vtanh.f32 %v1709_v22  ;;  %v1712_v45 = vadd.f32 %v4151_v10, %v1711_v30  ;;  %2842 = vmatmul.mubr.bf16.gmra.mrb[64].mxu0 %v1884_v41 }
 0x270   : > { %v3154_v39 = vpop.eup %3153  ;;  %3165 = vtanh.f32 %v1720_v38 }
 0x271   : > { %v3156_v26 = vpop.eup %3155  ;;  %3167 = vtanh.f32 %v1712_v45 }
 0x272   : > { %v3158_v57 = vpop.eup %3157 }
 0x273   : > { %v3160_v63 = vpop.eup %3159  ;;  %v2775_v15 = vpop.f32.mrb[76].mxu1  ;;  %v1886_v56 = vpack.c.bf16 %v3158_v57, %v3154_v39 }
 0x274   : > { %v1733_v3 = vadd.f32 %v2775_v15, %v4151_v10  ;;  %v1724_v17 = vpop.f32.mrb[77].mxu1  ;;  %v1885_v55 = vpack.c.bf16 %v3160_v63, %v3156_v26 }
 0x275   : > { %v1725_v23 = vadd.f32 %v4151_v10, %v1724_v17  ;;  %v2776_v49 = vpop.f32.mrb[78].mxu1 }
 0x276   : > { %3169 = vtanh.f32 %v1733_v3  ;;  %v1736_v42 = vadd.f32 %v2776_v49, %v4151_v10  ;;  %v1727_v1 = vpop.f32.mrb[79].mxu1  ;;  %2845 = vmatprep.mubr.bf16.mxu0 %v1885_v55 }
 0x277   : > { %3171 = vtanh.f32 %v1725_v23  ;;  %v1728_v54 = vadd.f32 %v4151_v10, %v1727_v1  ;;  %2846 = vmatmul.mubr.bf16.gmra.mrb[68].mxu0 %v1886_v56 }
 0x278   : > { %v3162_v20 = vpop.eup %3161  ;;  %3173 = vtanh.f32 %v1736_v42 }
 0x279   : > { %v3164_v6 = vpop.eup %3163  ;;  %3175 = vtanh.f32 %v1728_v54 }
 0x27a   : > { %v3166_v24 = vpop.eup %3165 }
 0x27b   : > { %v3168_v43 = vpop.eup %3167  ;;  %v2779_v29 = vpop.f32.mrb[80].mxu1  ;;  %v1888_v25 = vpack.c.bf16 %v3166_v24, %v3162_v20 }
 0x27c   : > { %v1749_v36 = vadd.f32 %v2779_v29, %v4151_v10  ;;  %v1740_v5 = vpop.f32.mrb[81].mxu1  ;;  %v1887_v46 = vpack.c.bf16 %v3168_v43, %v3164_v6 }
 0x27d   : > { %v1741_v32 = vadd.f32 %v4151_v10, %v1740_v5  ;;  %v2780_v33 = vpop.f32.mrb[82].mxu1 }
 0x27e   : > { %3177 = vtanh.f32 %v1749_v36  ;;  %v1752_v62 = vadd.f32 %v2780_v33, %v4151_v10  ;;  %v1743_v34 = vpop.f32.mrb[83].mxu1  ;;  %2849 = vmatprep.mubr.bf16.mxu0 %v1887_v46 }
 0x27f   : > { %3179 = vtanh.f32 %v1741_v32  ;;  %v1744_v16 = vadd.f32 %v4151_v10, %v1743_v34  ;;  %2850 = vmatmul.mubr.bf16.gmra.mrb[72].mxu0 %v1888_v25 }
 0x280   : > { %v3170_v58 = vpop.eup %3169  ;;  %3181 = vtanh.f32 %v1752_v62 }
 0x281   : > { %v3172_v14 = vpop.eup %3171  ;;  %3183 = vtanh.f32 %v1744_v16 }
 0x282   : > { %v3174_v48 = vpop.eup %3173 }
 0x283   : > { %v3176_v8 = vpop.eup %3175  ;;  %v2783_v19 = vpop.f32.mrb[84].mxu1  ;;  %v1890_v61 = vpack.c.bf16 %v3174_v48, %v3170_v58 }
 0x284   : > { %v1765_v60 = vadd.f32 %v2783_v19, %v4151_v10  ;;  %v1756_v51 = vpop.f32.mrb[85].mxu1  ;;  %v1889_v18 = vpack.c.bf16 %v3176_v8, %v3172_v14 }
 0x285   : > { %v1757_v40 = vadd.f32 %v4151_v10, %v1756_v51  ;;  %v2784_v7 = vpop.f32.mrb[86].mxu1 }
 0x286   : > { %3185 = vtanh.f32 %v1765_v60  ;;  %v1768_v44 = vadd.f32 %v2784_v7, %v4151_v10  ;;  %v1759_v21 = vpop.f32.mrb[87].mxu1  ;;  %2853 = vmatprep.mubr.bf16.mxu0 %v1889_v18 }
 0x287   : > { %3187 = vtanh.f32 %v1757_v40  ;;  %v1760_v4 = vadd.f32 %v4151_v10, %v1759_v21  ;;  %2854 = vmatmul.mubr.bf16.gmra.mrb[76].mxu0 %v1890_v61 }
 0x288   : > { %v3178_v0 = vpop.eup %3177  ;;  %3189 = vtanh.f32 %v1768_v44 }
 0x289   : > { %v3180_v13 = vpop.eup %3179  ;;  %3191 = vtanh.f32 %v1760_v4 }
 0x28a   : > { %v3182_v47 = vpop.eup %3181 }
 0x28b   : > { %v3184_v2 = vpop.eup %3183  ;;  %v2787_v53 = vpop.f32.mrb[88].mxu1  ;;  %v1892_v12 = vpack.c.bf16 %v3182_v47, %v3178_v0 }
 0x28c   : > { %v1781_v59 = vadd.f32 %v2787_v53, %v4151_v10  ;;  %v1772_v28 = vpop.f32.mrb[89].mxu1  ;;  %v1891_v50 = vpack.c.bf16 %v3184_v2, %v3180_v13 }
 0x28d   : > { %v1773_v37 = vadd.f32 %v4151_v10, %v1772_v28  ;;  %v2788_v9 = vpop.f32.mrb[90].mxu1 }
 0x28e   : > { %3193 = vtanh.f32 %v1781_v59  ;;  %v1784_v11 = vadd.f32 %v2788_v9, %v4151_v10  ;;  %v1775_v41 = vpop.f32.mrb[91].mxu1  ;;  %2857 = vmatprep.mubr.bf16.mxu0 %v1891_v50 }
 0x28f   : > { %3195 = vtanh.f32 %v1773_v37  ;;  %v1776_v35 = vadd.f32 %v4151_v10, %v1775_v41  ;;  %2858 = vmatmul.mubr.bf16.gmra.mrb[80].mxu0 %v1892_v12 }
 0x290   : > { %v3186_v31 = vpop.eup %3185  ;;  %3197 = vtanh.f32 %v1784_v11 }
 0x291   : > { %v3188_v27 = vpop.eup %3187  ;;  %3199 = vtanh.f32 %v1776_v35 }
 0x292   : > { %v3190_v22 = vpop.eup %3189 }
 0x293   : > { %v3192_v52 = vpop.eup %3191  ;;  %v2791_v38 = vpop.f32.mrb[92].mxu1  ;;  %v1894_v30 = vpack.c.bf16 %v3190_v22, %v3186_v31 }
 0x294   : > { %v1797_v45 = vadd.f32 %v2791_v38, %v4151_v10  ;;  %v1788_v39 = vpop.f32.mrb[93].mxu1  ;;  %v1893_v26 = vpack.c.bf16 %v3192_v52, %v3188_v27 }
 0x295   : > { %v1789_v57 = vadd.f32 %v4151_v10, %v1788_v39  ;;  %v2792_v63 = vpop.f32.mrb[94].mxu1 }
 0x296   : > { %3201 = vtanh.f32 %v1797_v45  ;;  %v1800_v15 = vadd.f32 %v2792_v63, %v4151_v10  ;;  %v1791_v56 = vpop.f32.mrb[95].mxu1  ;;  %2861 = vmatprep.mubr.bf16.mxu0 %v1893_v26 }
 0x297   : > { %3203 = vtanh.f32 %v1789_v57  ;;  %v1792_v3 = vadd.f32 %v4151_v10, %v1791_v56  ;;  %2862 = vmatmul.mubr.bf16.gmra.mrb[84].mxu0 %v1894_v30  ;;  %v4221_v10 = vld [vmem:[%s4365_s6] ss:$0 sm:$0xff] }
 0x298   : > { %v3194_v17 = vpop.eup %3193  ;;  %3205 = vtanh.f32 %v1800_v15 }
 0x299   : > { %v3196_v55 = vpop.eup %3195  ;;  %3207 = vtanh.f32 %v1792_v3 }
 0x29a   : > { %v3198_v23 = vpop.eup %3197 }
 0x29b   : > { %v3200_v49 = vpop.eup %3199  ;;  %v1896_v42 = vpack.c.bf16 %v3198_v23, %v3194_v17 }
 0x29c   : > { %v1895_v1 = vpack.c.bf16 %v3200_v49, %v3196_v55 }
 0x29e   : > { %2865 = vmatprep.mubr.bf16.mxu0 %v1895_v1 }
 0x29f   : > { %2866 = vmatmul.mubr.bf16.gmra.mrb[88].mxu0 %v1896_v42 }
 0x2a0   : > { %v3202_v54 = vpop.eup %3201 }
 0x2a1   : > { %v3204_v20 = vpop.eup %3203 }
 0x2a2   : > { %v3206_v6 = vpop.eup %3205 }
 0x2a3   : > { %v3208_v24 = vpop.eup %3207  ;;  %v1898_v43 = vpack.c.bf16 %v3206_v6, %v3202_v54 }
 0x2a4   : > { %v1897_v29 = vpack.c.bf16 %v3208_v24, %v3204_v20 }
 0x2a6   : > { %2869 = vmatprep.mubr.bf16.mxu0 %v1897_v29 }
 0x2a7   : > { %2870 = vmatmul.mubr.bf16.gmra.mrb[92].mxu0 %v1898_v43 }
 0x2dd   : > { %v2811_v25 = vpop.f32.mrb[32].mxu0 }
 0x2de   : > { %v2013_v36 = vadd.f32 %v2811_v25, %v4221_v10  ;;  %v2004_v5 = vpop.f32.mrb[33].mxu0 }
 0x2df   : > { %v2005_v46 = vadd.f32 %v4221_v10, %v2004_v5  ;;  %v2812_v32 = vpop.f32.mrb[34].mxu0 }
 0x2e0   : > { %2261 = vst [vmem:[%s4226_s26 + $0x10] sm:$0xff] %v2013_v36  ;;  %v2016_v33 = vadd.f32 %v2812_v32, %v4221_v10  ;;  %v2007_v62 = vpop.f32.mrb[35].mxu0 }
 0x2e1   : > { %2259 = vst [vmem:[%s4226_s26] sm:$0xff] %v2005_v46  ;;  %v2008_v34 = vadd.f32 %v4221_v10, %v2007_v62 }
 0x2e2   : > { %2262 = vst [vmem:[%s4226_s26 + $0x18] sm:$0xff] %v2016_v33 }
 0x2e3   : > { %2260 = vst [vmem:[%s4226_s26 + $0x8] sm:$0xff] %v2008_v34 }
 0x2e6   : > { %v2815_v16 = vpop.f32.mrb[36].mxu0 }
 0x2e7   : > { %v2029_v58 = vadd.f32 %v2815_v16, %v4221_v10  ;;  %v2020_v14 = vpop.f32.mrb[37].mxu0 }
 0x2e8   : > { %v2021_v48 = vadd.f32 %v4221_v10, %v2020_v14  ;;  %v2816_v8 = vpop.f32.mrb[38].mxu0 }
 0x2e9   : > { %2265 = vst [vmem:[%s4226_s26 + $0x30] sm:$0xff] %v2029_v58  ;;  %v2032_v19 = vadd.f32 %v2816_v8, %v4221_v10  ;;  %v2023_v61 = vpop.f32.mrb[39].mxu0 }
 0x2ea   : > { %2263 = vst [vmem:[%s4226_s26 + $0x20] sm:$0xff] %v2021_v48  ;;  %v2024_v60 = vadd.f32 %v4221_v10, %v2023_v61 }
 0x2eb   : > { %2266 = vst [vmem:[%s4226_s26 + $0x38] sm:$0xff] %v2032_v19 }
 0x2ec   : > { %2264 = vst [vmem:[%s4226_s26 + $0x28] sm:$0xff] %v2024_v60 }
 0x2f5   : > { %v2819_v51 = vpop.f32.mrb[40].mxu0 }
 0x2f6   : > { %v2045_v18 = vadd.f32 %v2819_v51, %v4221_v10  ;;  %v2036_v40 = vpop.f32.mrb[41].mxu0 }
 0x2f7   : > { %v2037_v7 = vadd.f32 %v4221_v10, %v2036_v40  ;;  %v2820_v44 = vpop.f32.mrb[42].mxu0 }
 0x2f8   : > { %2269 = vst [vmem:[%s4226_s26 + $0x50] sm:$0xff] %v2045_v18  ;;  %v2048_v21 = vadd.f32 %v2820_v44, %v4221_v10  ;;  %v2039_v4 = vpop.f32.mrb[43].mxu0 }
 0x2f9   : > { %2267 = vst [vmem:[%s4226_s26 + $0x40] sm:$0xff] %v2037_v7  ;;  %v2040_v0 = vadd.f32 %v4221_v10, %v2039_v4 }
 0x2fa   : > { %2270 = vst [vmem:[%s4226_s26 + $0x58] sm:$0xff] %v2048_v21 }
 0x2fb   : > { %2268 = vst [vmem:[%s4226_s26 + $0x48] sm:$0xff] %v2040_v0 }
 0x305   : > { %v2823_v13 = vpop.f32.mrb[44].mxu0 }
 0x306   : > { %v2061_v47 = vadd.f32 %v2823_v13, %v4221_v10  ;;  %v2052_v2 = vpop.f32.mrb[45].mxu0 }
 0x307   : > { %v2053_v53 = vadd.f32 %v4221_v10, %v2052_v2  ;;  %v2824_v12 = vpop.f32.mrb[46].mxu0 }
 0x308   : > { %2273 = vst [vmem:[%s4226_s26 + $0x70] sm:$0xff] %v2061_v47  ;;  %v2064_v59 = vadd.f32 %v2824_v12, %v4221_v10  ;;  %v2055_v28 = vpop.f32.mrb[47].mxu0 }
 0x309   : > { %2271 = vst [vmem:[%s4226_s26 + $0x60] sm:$0xff] %v2053_v53  ;;  %v2056_v50 = vadd.f32 %v4221_v10, %v2055_v28 }
 0x30a   : > { %2274 = vst [vmem:[%s4226_s26 + $0x78] sm:$0xff] %v2064_v59 }
 0x30b   : > { %2272 = vst [vmem:[%s4226_s26 + $0x68] sm:$0xff] %v2056_v50 }
 0x31d   : > { %v2827_v37 = vpop.f32.mrb[48].mxu0 }
 0x31e   : > { %v2077_v9 = vadd.f32 %v2827_v37, %v4221_v10  ;;  %v2068_v11 = vpop.f32.mrb[49].mxu0 }
 0x31f   : > { %v2069_v41 = vadd.f32 %v4221_v10, %v2068_v11  ;;  %v2828_v35 = vpop.f32.mrb[50].mxu0 }
 0x320   : > { %2277 = vst [vmem:[%s4226_s26 + $0x90] sm:$0xff] %v2077_v9  ;;  %v2080_v31 = vadd.f32 %v2828_v35, %v4221_v10  ;;  %v2071_v27 = vpop.f32.mrb[51].mxu0 }
 0x321   : > { %2275 = vst [vmem:[%s4226_s26 + $0x80] sm:$0xff] %v2069_v41  ;;  %v2072_v22 = vadd.f32 %v4221_v10, %v2071_v27 }
 0x322   : > { %2278 = vst [vmem:[%s4226_s26 + $0x98] sm:$0xff] %v2080_v31 }
 0x323   : > { %2276 = vst [vmem:[%s4226_s26 + $0x88] sm:$0xff] %v2072_v22 }
 0x327   : > { %v2831_v52 = vpop.f32.mrb[52].mxu0 }
 0x328   : > { %v2093_v38 = vadd.f32 %v2831_v52, %v4221_v10  ;;  %v2084_v30 = vpop.f32.mrb[53].mxu0 }
 0x329   : > { %v2085_v45 = vadd.f32 %v4221_v10, %v2084_v30  ;;  %v2832_v39 = vpop.f32.mrb[54].mxu0 }
 0x32a   : > { %2281 = vst [vmem:[%s4226_s26 + $0xb0] sm:$0xff] %v2093_v38  ;;  %v2096_v26 = vadd.f32 %v2832_v39, %v4221_v10  ;;  %v2087_v57 = vpop.f32.mrb[55].mxu0 }
 0x32b   : > { %2279 = vst [vmem:[%s4226_s26 + $0xa0] sm:$0xff] %v2085_v45  ;;  %v2088_v63 = vadd.f32 %v4221_v10, %v2087_v57 }
 0x32c   : > { %2282 = vst [vmem:[%s4226_s26 + $0xb8] sm:$0xff] %v2096_v26 }
 0x32d   : > { %2280 = vst [vmem:[%s4226_s26 + $0xa8] sm:$0xff] %v2088_v63 }
 0x330   : > { %v2835_v15 = vpop.f32.mrb[56].mxu0 }
 0x331   : > { %v2109_v56 = vadd.f32 %v2835_v15, %v4221_v10  ;;  %v2100_v3 = vpop.f32.mrb[57].mxu0 }
 0x332   : > { %v2101_v17 = vadd.f32 %v4221_v10, %v2100_v3  ;;  %v2836_v55 = vpop.f32.mrb[58].mxu0 }
 0x333   : > { %2285 = vst [vmem:[%s4226_s26 + $0xd0] sm:$0xff] %v2109_v56  ;;  %v2112_v23 = vadd.f32 %v2836_v55, %v4221_v10  ;;  %v2103_v49 = vpop.f32.mrb[59].mxu0 }
 0x334   : > { %2283 = vst [vmem:[%s4226_s26 + $0xc0] sm:$0xff] %v2101_v17  ;;  %v2104_v42 = vadd.f32 %v4221_v10, %v2103_v49 }
 0x335   : > { %2286 = vst [vmem:[%s4226_s26 + $0xd8] sm:$0xff] %v2112_v23 }
 0x336   : > { %2284 = vst [vmem:[%s4226_s26 + $0xc8] sm:$0xff] %v2104_v42 }
 0x33a   : > { %v2839_v1 = vpop.f32.mrb[60].mxu0 }
 0x33b   : > { %v2125_v54 = vadd.f32 %v2839_v1, %v4221_v10  ;;  %v2116_v20 = vpop.f32.mrb[61].mxu0 }
 0x33c   : > { %v2117_v6 = vadd.f32 %v4221_v10, %v2116_v20  ;;  %v2840_v24 = vpop.f32.mrb[62].mxu0 }
 0x33d   : > { %2289 = vst [vmem:[%s4226_s26 + $0xf0] sm:$0xff] %v2125_v54  ;;  %v2128_v43 = vadd.f32 %v2840_v24, %v4221_v10  ;;  %v2119_v29 = vpop.f32.mrb[63].mxu0 }
 0x33e   : > { %2287 = vst [vmem:[%s4226_s26 + $0xe0] sm:$0xff] %v2117_v6  ;;  %v2120_v25 = vadd.f32 %v4221_v10, %v2119_v29 }
 0x33f   : > { %2290 = vst [vmem:[%s4226_s26 + $0xf8] sm:$0xff] %v2128_v43 }
 0x340   : > { %2288 = vst [vmem:[%s4226_s26 + $0xe8] sm:$0xff] %v2120_v25 }
 0x342   : > { %v2843_v36 = vpop.f32.mrb[64].mxu0 }
 0x343   : > { %v2141_v5 = vadd.f32 %v2843_v36, %v4221_v10  ;;  %v2132_v46 = vpop.f32.mrb[65].mxu0 }
 0x344   : > { %v2133_v32 = vadd.f32 %v4221_v10, %v2132_v46  ;;  %v2844_v33 = vpop.f32.mrb[66].mxu0 }
 0x345   : > { %2293 = vst [vmem:[%s4226_s26 + $0x110] sm:$0xff] %v2141_v5  ;;  %v2144_v62 = vadd.f32 %v2844_v33, %v4221_v10  ;;  %v2135_v34 = vpop.f32.mrb[67].mxu0 }
 0x346   : > { %2291 = vst [vmem:[%s4226_s26 + $0x100] sm:$0xff] %v2133_v32  ;;  %v2136_v16 = vadd.f32 %v4221_v10, %v2135_v34 }
 0x347   : > { %2294 = vst [vmem:[%s4226_s26 + $0x118] sm:$0xff] %v2144_v62 }
 0x348   : > { %2292 = vst [vmem:[%s4226_s26 + $0x108] sm:$0xff] %v2136_v16 }
 0x34a   : > { %v2847_v58 = vpop.f32.mrb[68].mxu0 }
 0x34b   : > { %v2157_v14 = vadd.f32 %v2847_v58, %v4221_v10  ;;  %v2148_v48 = vpop.f32.mrb[69].mxu0 }
 0x34c   : > { %v2149_v8 = vadd.f32 %v4221_v10, %v2148_v48  ;;  %v2848_v19 = vpop.f32.mrb[70].mxu0 }
 0x34d   : > { %2297 = vst [vmem:[%s4226_s26 + $0x130] sm:$0xff] %v2157_v14  ;;  %v2160_v61 = vadd.f32 %v2848_v19, %v4221_v10  ;;  %v2151_v60 = vpop.f32.mrb[71].mxu0 }
 0x34e   : > { %2295 = vst [vmem:[%s4226_s26 + $0x120] sm:$0xff] %v2149_v8  ;;  %v2152_v51 = vadd.f32 %v4221_v10, %v2151_v60 }
 0x34f   : > { %2298 = vst [vmem:[%s4226_s26 + $0x138] sm:$0xff] %v2160_v61 }
 0x350   : > { %2296 = vst [vmem:[%s4226_s26 + $0x128] sm:$0xff] %v2152_v51 }
 0x352   : > { %v2851_v18 = vpop.f32.mrb[72].mxu0 }
 0x353   : > { %v2173_v40 = vadd.f32 %v2851_v18, %v4221_v10  ;;  %v2164_v7 = vpop.f32.mrb[73].mxu0 }
 0x354   : > { %v2165_v44 = vadd.f32 %v4221_v10, %v2164_v7  ;;  %v2852_v21 = vpop.f32.mrb[74].mxu0 }
 0x355   : > { %2301 = vst [vmem:[%s4226_s26 + $0x150] sm:$0xff] %v2173_v40  ;;  %v2176_v4 = vadd.f32 %v2852_v21, %v4221_v10  ;;  %v2167_v0 = vpop.f32.mrb[75].mxu0 }
 0x356   : > { %2299 = vst [vmem:[%s4226_s26 + $0x140] sm:$0xff] %v2165_v44  ;;  %v2168_v13 = vadd.f32 %v4221_v10, %v2167_v0 }
 0x357   : > { %2302 = vst [vmem:[%s4226_s26 + $0x158] sm:$0xff] %v2176_v4 }
 0x358   : > { %2300 = vst [vmem:[%s4226_s26 + $0x148] sm:$0xff] %v2168_v13 }
 0x35a   : > { %v2855_v47 = vpop.f32.mrb[76].mxu0 }
 0x35b   : > { %v2189_v2 = vadd.f32 %v2855_v47, %v4221_v10  ;;  %v2180_v53 = vpop.f32.mrb[77].mxu0 }
 0x35c   : > { %v2181_v12 = vadd.f32 %v4221_v10, %v2180_v53  ;;  %v2856_v59 = vpop.f32.mrb[78].mxu0 }
 0x35d   : > { %2305 = vst [vmem:[%s4226_s26 + $0x170] sm:$0xff] %v2189_v2  ;;  %v2192_v28 = vadd.f32 %v2856_v59, %v4221_v10  ;;  %v2183_v50 = vpop.f32.mrb[79].mxu0 }
 0x35e   : > { %2303 = vst [vmem:[%s4226_s26 + $0x160] sm:$0xff] %v2181_v12  ;;  %v2184_v37 = vadd.f32 %v4221_v10, %v2183_v50 }
 0x35f   : > { %2306 = vst [vmem:[%s4226_s26 + $0x178] sm:$0xff] %v2192_v28 }
 0x360   : > { %2304 = vst [vmem:[%s4226_s26 + $0x168] sm:$0xff] %v2184_v37 }
 0x362   : > { %v2859_v9 = vpop.f32.mrb[80].mxu0 }
 0x363   : > { %v2205_v11 = vadd.f32 %v2859_v9, %v4221_v10  ;;  %v2196_v41 = vpop.f32.mrb[81].mxu0 }
 0x364   : > { %v2197_v35 = vadd.f32 %v4221_v10, %v2196_v41  ;;  %v2860_v31 = vpop.f32.mrb[82].mxu0 }
 0x365   : > { %2309 = vst [vmem:[%s4226_s26 + $0x190] sm:$0xff] %v2205_v11  ;;  %v2208_v27 = vadd.f32 %v2860_v31, %v4221_v10  ;;  %v2199_v22 = vpop.f32.mrb[83].mxu0 }
 0x366   : > { %2307 = vst [vmem:[%s4226_s26 + $0x180] sm:$0xff] %v2197_v35  ;;  %v2200_v52 = vadd.f32 %v4221_v10, %v2199_v22 }
 0x367   : > { %2310 = vst [vmem:[%s4226_s26 + $0x198] sm:$0xff] %v2208_v27 }
 0x368   : > { %2308 = vst [vmem:[%s4226_s26 + $0x188] sm:$0xff] %v2200_v52 }
 0x36a   : > { %v2863_v38 = vpop.f32.mrb[84].mxu0 }
 0x36b   : > { %v2221_v30 = vadd.f32 %v2863_v38, %v4221_v10  ;;  %v2212_v45 = vpop.f32.mrb[85].mxu0 }
 0x36c   : > { %v2213_v39 = vadd.f32 %v4221_v10, %v2212_v45  ;;  %v2864_v26 = vpop.f32.mrb[86].mxu0 }
 0x36d   : > { %2313 = vst [vmem:[%s4226_s26 + $0x1b0] sm:$0xff] %v2221_v30  ;;  %v2224_v57 = vadd.f32 %v2864_v26, %v4221_v10  ;;  %v2215_v63 = vpop.f32.mrb[87].mxu0 }
 0x36e   : > { %2311 = vst [vmem:[%s4226_s26 + $0x1a0] sm:$0xff] %v2213_v39  ;;  %v2216_v15 = vadd.f32 %v4221_v10, %v2215_v63 }
 0x36f   : > { %2314 = vst [vmem:[%s4226_s26 + $0x1b8] sm:$0xff] %v2224_v57 }
 0x370   : > { %2312 = vst [vmem:[%s4226_s26 + $0x1a8] sm:$0xff] %v2216_v15 }
 0x372   : > { %v2867_v56 = vpop.f32.mrb[88].mxu0 }
 0x373   : > { %v2237_v3 = vadd.f32 %v2867_v56, %v4221_v10  ;;  %v2228_v17 = vpop.f32.mrb[89].mxu0 }
 0x374   : > { %v2229_v55 = vadd.f32 %v4221_v10, %v2228_v17  ;;  %v2868_v23 = vpop.f32.mrb[90].mxu0 }
 0x375   : > { %2317 = vst [vmem:[%s4226_s26 + $0x1d0] sm:$0xff] %v2237_v3  ;;  %v2240_v49 = vadd.f32 %v2868_v23, %v4221_v10  ;;  %v2231_v42 = vpop.f32.mrb[91].mxu0 }
 0x376   : > { %2315 = vst [vmem:[%s4226_s26 + $0x1c0] sm:$0xff] %v2229_v55  ;;  %v2232_v1 = vadd.f32 %v4221_v10, %v2231_v42 }
 0x377   : > { %2318 = vst [vmem:[%s4226_s26 + $0x1d8] sm:$0xff] %v2240_v49 }
 0x378   : > { %2316 = vst [vmem:[%s4226_s26 + $0x1c8] sm:$0xff] %v2232_v1 }
 0x37a   : > { %v2871_v54 = vpop.f32.mrb[92].mxu0 }
 0x37b   : > { %v2253_v20 = vadd.f32 %v2871_v54, %v4221_v10  ;;  %v2244_v6 = vpop.f32.mrb[93].mxu0 }
 0x37c   : > { %v2245_v24 = vadd.f32 %v4221_v10, %v2244_v6  ;;  %v2872_v43 = vpop.f32.mrb[94].mxu0 }
 0x37d   : > { %2321 = vst [vmem:[%s4226_s26 + $0x1f0] sm:$0xff] %v2253_v20  ;;  %v2256_v29 = vadd.f32 %v2872_v43, %v4221_v10  ;;  %v2247_v25 = vpop.f32.mrb[95].mxu0 }
 0x37e   : > { %2319 = vst [vmem:[%s4226_s26 + $0x1e0] sm:$0xff] %v2245_v24  ;;  %v2248_v36 = vadd.f32 %v4221_v10, %v2247_v25 }
 0x37f   : > { %2322 = vst [vmem:[%s4226_s26 + $0x1f8] sm:$0xff] %v2256_v29 }
 0x380   : > { %2320 = vst [vmem:[%s4226_s26 + $0x1e8] sm:$0xff] %v2248_v36 }
 0x381 PF: > { %s17_s24 = sadd.s32 1, %s3216_s24  }
 0x382   : > { %p14_p4 = scmp.ge.s32.totalorder %s17_s24, 4  }
 0x384   :  { %16 = sbr.rel (!%p14_p4) target bundleno = 1 (0x1), region = 78 }

</bundles_post_ra>
